<compile_context>
chip_gen: v6e
topology: v6e:2x2x1
jax: 0.10.0
libtpu: 0.0.40
codegen_flags: <defaults>
</compile_context>

<pallas_src>
import functools

import jax
import jax.numpy as jnp
from jax.experimental import pallas as pl
from jax.experimental.pallas import tpu as pltpu


LANE = 128      # TPU lane width (last dim)
SUBLANE = 8     # f32 sublane tile (second-minor dim)
B_TILE = 8      # batch rows per grid step (one full sublane tile)


def _round_up(x, m):
    return (x + m - 1) // m * m


def make_rnn_kernel(num_layers: int, seq_len: int):
    """Pallas kernel closed over static layer count / sequence length."""

    def kernel(x_ref, *refs):
        # refs = [w_ih_T_0, w_hh_T_0, b_0, ..., w_ih_T_{L-1}, w_hh_T_{L-1},
        #         b_{L-1}, w_fc_T, b_fc, out_ref, acts_scratch]
        acts_ref = refs[-1]            # VMEM scratch (T*B_TILE, H_pad)
        out_ref = refs[-2]             # (B_TILE, O_pad)
        w_fc_ref = refs[-4]            # (H_pad, O_pad)
        b_fc_ref = refs[-3]            # (1, O_pad)
        layer_refs = refs[:-4]

        T = seq_len
        H_pad = acts_ref.shape[-1]

        # Layer-0 input: one contiguous time-major slab (T*B_TILE, D_in_pad).
        inp_flat = x_ref[0]

        h = None
        for l in range(num_layers):
            # Hoisted, loaded once per layer (not per timestep).
            w_ih = layer_refs[3 * l][...]       # (D_in_l, H_pad)
            w_hh = layer_refs[3 * l + 1][...]   # (H_pad, H_pad)
            b = layer_refs[3 * l + 2][...]      # (1, H_pad)  (= b_ih + b_hh)

            # Batched input projection for all timesteps: one big GEMM,
            # bias folded in -> nothing but h @ W_hh remains in the recurrence.
            acts_ref[...] = (
                jnp.dot(inp_flat, w_ih, preferred_element_type=jnp.float32) + b)

            is_last = l == num_layers - 1
            h = jnp.zeros((B_TILE, H_pad), jnp.float32)   # h0 = 0 (PyTorch)

            # Fully-unrolled serial recurrence (T static & small).
            for t in range(T):
                p_t = acts_ref[pl.ds(t * B_TILE, B_TILE), :]
                h = jnp.tanh(
                    p_t + jnp.dot(h, w_hh, preferred_element_type=jnp.float32))
                if not is_last:
                    # Store this layer's output sequence for the next layer.
                    acts_ref[pl.ds(t * B_TILE, B_TILE), :] = h

            if not is_last:
                inp_flat = acts_ref[...]        # (T*B_TILE, H_pad)

        # FC head on the last timestep of the top layer (lane-dense O_pad).
        out_ref[...] = (
            jnp.dot(h, w_fc_ref[...], preferred_element_type=jnp.float32)
            + b_fc_ref[...]).astype(out_ref.dtype)

    return kernel


def init_params(key, input_dim, hidden_dim, layer_dim, output_dim):
    """Deterministic PyTorch-style uniform(-1/sqrt(H), 1/sqrt(H)) init."""
    params = {"layers": []}
    bound = 1.0 / jnp.sqrt(jnp.float32(hidden_dim))
    for l in range(layer_dim):
        d_in = input_dim if l == 0 else hidden_dim
        key, k1, k2, k3, k4 = jax.random.split(key, 5)
        w_ih = jax.random.uniform(k1, (hidden_dim, d_in), jnp.float32, -bound, bound)
        w_hh = jax.random.uniform(k2, (hidden_dim, hidden_dim), jnp.float32, -bound, bound)
        b_ih = jax.random.uniform(k3, (hidden_dim,), jnp.float32, -bound, bound)
        b_hh = jax.random.uniform(k4, (hidden_dim,), jnp.float32, -bound, bound)
        params["layers"].append((w_ih, w_hh, b_ih, b_hh))
    key, k5, k6 = jax.random.split(key, 3)
    params["w_fc"] = jax.random.uniform(
        k5, (output_dim, hidden_dim), jnp.float32, -bound, bound)
    params["b_fc"] = jax.random.uniform(
        k6, (output_dim,), jnp.float32, -bound, bound)
    return params


def pack_params(params):
    """One-time parameter prep: transpose to (in, out), pre-sum b_ih + b_hh,
    zero-pad hidden / output feature dims to the 128-lane boundary."""
    layers = params["layers"]
    H = layers[0][1].shape[0]
    O = params["w_fc"].shape[0]
    H_pad = _round_up(H, LANE)
    O_pad = _round_up(O, LANE)

    packed = []
    for l, (w_ih, w_hh, b_ih, b_hh) in enumerate(layers):
        d_in = w_ih.shape[1]
        d_in_pad = _round_up(d_in, SUBLANE) if l == 0 else H_pad
        w_ih_t = jnp.zeros((d_in_pad, H_pad), jnp.float32).at[:d_in, :H].set(w_ih.T)
        w_hh_t = jnp.zeros((H_pad, H_pad), jnp.float32).at[:H, :H].set(w_hh.T)
        b = jnp.zeros((1, H_pad), jnp.float32).at[0, :H].set(b_ih + b_hh)
        packed += [w_ih_t, w_hh_t, b]
    w_fc_t = jnp.zeros((H_pad, O_pad), jnp.float32).at[:H, :O].set(params["w_fc"].T)
    b_fc = jnp.zeros((1, O_pad), jnp.float32).at[0, :O].set(params["b_fc"])
    packed += [w_fc_t, b_fc]
    return packed


@functools.partial(jax.jit, static_argnames=("layer_dim", "output_dim"))
def rnn_model_forward(x, packed_params, *, layer_dim, output_dim):
    """x: (B, T, D_in) float32 -> (B, output_dim) float32."""
    B, T, D_in = x.shape
    d_in_pad = packed_params[0].shape[0]
    H_pad = packed_params[1].shape[0]
    O_pad = packed_params[-1].shape[1]

    B_pad = _round_up(B, B_TILE)
    n_chunks = B_pad // B_TILE

    # Time-major, zero-padded batch & input-feature dims, then regrouped so
    # each batch chunk is one contiguous (T*B_TILE, D_in_pad) slab -> no
    # in-kernel reshapes, one clean DMA per grid step.
    x_tm = jnp.transpose(x, (1, 0, 2))                                   # (T, B, D)
    x_tm = jnp.pad(x_tm, ((0, 0), (0, B_pad - B), (0, d_in_pad - D_in)))  # (T, Bp, Dp)
    x_blk = x_tm.reshape(T, n_chunks, B_TILE, d_in_pad)
    x_blk = jnp.transpose(x_blk, (1, 0, 2, 3)).reshape(
        n_chunks, T * B_TILE, d_in_pad)

    const2 = lambda b: (0, 0)
    in_specs = [pl.BlockSpec((1, T * B_TILE, d_in_pad), lambda b: (b, 0, 0))]
    in_specs += [pl.BlockSpec(p.shape, const2) for p in packed_params]

    out = pl.pallas_call(
        make_rnn_kernel(layer_dim, T),
        out_shape=jax.ShapeDtypeStruct((B_pad, O_pad), jnp.float32),
        grid=(n_chunks,),
        in_specs=in_specs,
        out_specs=pl.BlockSpec((B_TILE, O_pad), lambda b: (b, 0)),
        scratch_shapes=[pltpu.VMEM((T * B_TILE, H_pad), jnp.float32)],
        compiler_params=pltpu.CompilerParams(
            dimension_semantics=("parallel",)),
    )(x_blk, *packed_params)

    return out[:B, :output_dim]


def rnn_model_reference(x, params):
    """Pure-JAX reference mirroring the PyTorch forward."""
    B, T, _ = x.shape
    layer_in = x
    for (w_ih, w_hh, b_ih, b_hh) in params["layers"]:
        H = w_hh.shape[0]
        h = jnp.zeros((B, H), jnp.float32)
        outs = []
        for t in range(T):
            h = jnp.tanh(layer_in[:, t, :] @ w_ih.T + b_ih + h @ w_hh.T + b_hh)
            outs.append(h)
        layer_in = jnp.stack(outs, axis=1)
    last = layer_in[:, -1, :]
    return last @ params["w_fc"].T + params["b_fc"]


if __name__ == "__main__":
    # Small shapes consistent with the module: batch=4, seq=8,
    # input_dim=16, hidden_dim=32, layer_dim=2, output_dim=8.
    B, T, D_IN, H, L, O = 4, 8, 16, 32, 2, 8

    key = jax.random.PRNGKey(0)
    key, kx = jax.random.split(key)
    x = jax.random.normal(kx, (B, T, D_IN), dtype=jnp.float32)

    params = init_params(key, D_IN, H, L, O)
    packed = pack_params(params)          # one-time param prep (not per call)

    out = rnn_model_forward(x, packed, layer_dim=L, output_dim=O)
    jax.block_until_ready(out)

    ref = rnn_model_reference(x, params)
    assert out.shape == (B, O)
    max_err = jnp.max(jnp.abs(out - ref))
    assert jnp.allclose(out, ref, atol=1e-5, rtol=1e-5), (
        f"mismatch vs reference, max abs err {max_err}")

    print("KERNEL_OK")
</pallas_src>

<mosaic_0001>
module attributes {stable_mosaic.version = 11 : i64} {
  func.func @kernel(%arg0: i32, %arg1: memref<1x64x16xf32, #tpu.memory_space<vmem>>, %arg2: memref<16x128xf32, #tpu.memory_space<vmem>>, %arg3: memref<128x128xf32, #tpu.memory_space<vmem>>, %arg4: memref<1x128xf32, #tpu.memory_space<vmem>>, %arg5: memref<128x128xf32, #tpu.memory_space<vmem>>, %arg6: memref<128x128xf32, #tpu.memory_space<vmem>>, %arg7: memref<1x128xf32, #tpu.memory_space<vmem>>, %arg8: memref<128x128xf32, #tpu.memory_space<vmem>>, %arg9: memref<1x128xf32, #tpu.memory_space<vmem>>, %arg10: memref<8x128xf32, #tpu.memory_space<vmem>>, %arg11: memref<64x128xf32, #tpu.memory_space<vmem>>) attributes {dimension_semantics = [#tpu.dimension_semantics<parallel>], iteration_bounds = array<i64: 1>, scalar_prefetch = 0 : i64, scratch_operands = 1 : i64, tpu.core_type = #tpu.core_type<tc>, window_params = [{transform_indices = @transform_0, window_bounds = array<i64: 1, 64, 16>}, {pipeline_mode = #tpu.pipeline_mode<synchronous>, transform_indices = @transform_1, window_bounds = array<i64: 16, 128>}, {pipeline_mode = #tpu.pipeline_mode<synchronous>, transform_indices = @transform_2, window_bounds = array<i64: 128, 128>}, {pipeline_mode = #tpu.pipeline_mode<synchronous>, transform_indices = @transform_3, window_bounds = array<i64: 1, 128>}, {pipeline_mode = #tpu.pipeline_mode<synchronous>, transform_indices = @transform_4, window_bounds = array<i64: 128, 128>}, {pipeline_mode = #tpu.pipeline_mode<synchronous>, transform_indices = @transform_5, window_bounds = array<i64: 128, 128>}, {pipeline_mode = #tpu.pipeline_mode<synchronous>, transform_indices = @transform_6, window_bounds = array<i64: 1, 128>}, {pipeline_mode = #tpu.pipeline_mode<synchronous>, transform_indices = @transform_7, window_bounds = array<i64: 128, 128>}, {pipeline_mode = #tpu.pipeline_mode<synchronous>, transform_indices = @transform_8, window_bounds = array<i64: 1, 128>}, {transform_indices = @transform_9, window_bounds = array<i64: 8, 128>}]} {
    %c0 = arith.constant 0 : index
    %c0_0 = arith.constant 0 : index
    %c0_1 = arith.constant 0 : index
    %0 = vector.load %arg1[%c0, %c0_0, %c0_1] : memref<1x64x16xf32, #tpu.memory_space<vmem>>, vector<1x64x16xf32>
    %1 = vector.shape_cast %0 : vector<1x64x16xf32> to vector<64x16xf32>
    %c0_2 = arith.constant 0 : index
    %c0_3 = arith.constant 0 : index
    %2 = vector.load %arg2[%c0_2, %c0_3] : memref<16x128xf32, #tpu.memory_space<vmem>>, vector<16x128xf32>
    %c0_4 = arith.constant 0 : index
    %c0_5 = arith.constant 0 : index
    %3 = vector.load %arg3[%c0_4, %c0_5] : memref<128x128xf32, #tpu.memory_space<vmem>>, vector<128x128xf32>
    %c0_6 = arith.constant 0 : index
    %c0_7 = arith.constant 0 : index
    %4 = vector.load %arg4[%c0_6, %c0_7] : memref<1x128xf32, #tpu.memory_space<vmem>>, vector<1x128xf32>
    %cst = arith.constant dense<0.000000e+00> : vector<64x128xf32>
    %5 = tpu.matmul %1, %2, %cst {dimension_numbers = #tpu.dot_dimension_numbers<[1], [0], [0], [1], [0, 0, 1, 1], [], []>} : vector<64x16xf32>, vector<16x128xf32>, vector<64x128xf32> -> vector<64x128xf32>
    %6 = vector.broadcast %4 : vector<1x128xf32> to vector<64x128xf32>
    %7 = arith.addf %5, %6 : vector<64x128xf32>
    %c0_8 = arith.constant 0 : index
    %c0_9 = arith.constant 0 : index
    %8 = vector.load %arg11[%c0_8, %c0_9] : memref<64x128xf32, #tpu.memory_space<vmem>>, vector<64x128xf32>
    tpu.vector_store %arg11[%c0_8, %c0_9], %7 {strides = array<i32>} : memref<64x128xf32, #tpu.memory_space<vmem>>, vector<64x128xf32>,
    %cst_10 = arith.constant 0.000000e+00 : f32
    %9 = vector.broadcast %cst_10 : f32 to vector<8x128xf32>
    %c0_11 = arith.constant 0 : index
    %c0_12 = arith.constant 0 : index
    %10 = vector.load %arg11[%c0_11, %c0_12] : memref<64x128xf32, #tpu.memory_space<vmem>>, vector<8x128xf32>
    %cst_13 = arith.constant dense<0.000000e+00> : vector<8x128xf32>
    %11 = tpu.matmul %9, %3, %cst_13 {dimension_numbers = #tpu.dot_dimension_numbers<[1], [0], [0], [1], [0, 0, 1, 1], [], []>} : vector<8x128xf32>, vector<128x128xf32>, vector<8x128xf32> -> vector<8x128xf32>
    %12 = arith.addf %10, %11 : vector<8x128xf32>
    %13 = math.tanh %12 : vector<8x128xf32>
    %c0_14 = arith.constant 0 : index
    %c0_15 = arith.constant 0 : index
    %14 = vector.load %arg11[%c0_14, %c0_15] : memref<64x128xf32, #tpu.memory_space<vmem>>, vector<8x128xf32>
    tpu.vector_store %arg11[%c0_14, %c0_15], %13 {strides = array<i32>} : memref<64x128xf32, #tpu.memory_space<vmem>>, vector<8x128xf32>,
    %c8 = arith.constant 8 : index
    %c0_16 = arith.constant 0 : index
    %15 = vector.load %arg11[%c8, %c0_16] : memref<64x128xf32, #tpu.memory_space<vmem>>, vector<8x128xf32>
    %cst_17 = arith.constant dense<0.000000e+00> : vector<8x128xf32>
    %16 = tpu.matmul %13, %3, %cst_17 {dimension_numbers = #tpu.dot_dimension_numbers<[1], [0], [0], [1], [0, 0, 1, 1], [], []>} : vector<8x128xf32>, vector<128x128xf32>, vector<8x128xf32> -> vector<8x128xf32>
    %17 = arith.addf %15, %16 : vector<8x128xf32>
    %18 = math.tanh %17 : vector<8x128xf32>
    %c8_18 = arith.constant 8 : index
    %c0_19 = arith.constant 0 : index
    %19 = vector.load %arg11[%c8_18, %c0_19] : memref<64x128xf32, #tpu.memory_space<vmem>>, vector<8x128xf32>
    tpu.vector_store %arg11[%c8_18, %c0_19], %18 {strides = array<i32>} : memref<64x128xf32, #tpu.memory_space<vmem>>, vector<8x128xf32>,
    %c16 = arith.constant 16 : index
    %c0_20 = arith.constant 0 : index
    %20 = vector.load %arg11[%c16, %c0_20] : memref<64x128xf32, #tpu.memory_space<vmem>>, vector<8x128xf32>
    %cst_21 = arith.constant dense<0.000000e+00> : vector<8x128xf32>
    %21 = tpu.matmul %18, %3, %cst_21 {dimension_numbers = #tpu.dot_dimension_numbers<[1], [0], [0], [1], [0, 0, 1, 1], [], []>} : vector<8x128xf32>, vector<128x128xf32>, vector<8x128xf32> -> vector<8x128xf32>
    %22 = arith.addf %20, %21 : vector<8x128xf32>
    %23 = math.tanh %22 : vector<8x128xf32>
    %c16_22 = arith.constant 16 : index
    %c0_23 = arith.constant 0 : index
    %24 = vector.load %arg11[%c16_22, %c0_23] : memref<64x128xf32, #tpu.memory_space<vmem>>, vector<8x128xf32>
    tpu.vector_store %arg11[%c16_22, %c0_23], %23 {strides = array<i32>} : memref<64x128xf32, #tpu.memory_space<vmem>>, vector<8x128xf32>,
    %c24 = arith.constant 24 : index
    %c0_24 = arith.constant 0 : index
    %25 = vector.load %arg11[%c24, %c0_24] : memref<64x128xf32, #tpu.memory_space<vmem>>, vector<8x128xf32>
    %cst_25 = arith.constant dense<0.000000e+00> : vector<8x128xf32>
    %26 = tpu.matmul %23, %3, %cst_25 {dimension_numbers = #tpu.dot_dimension_numbers<[1], [0], [0], [1], [0, 0, 1, 1], [], []>} : vector<8x128xf32>, vector<128x128xf32>, vector<8x128xf32> -> vector<8x128xf32>
    %27 = arith.addf %25, %26 : vector<8x128xf32>
    %28 = math.tanh %27 : vector<8x128xf32>
    %c24_26 = arith.constant 24 : index
    %c0_27 = arith.constant 0 : index
    %29 = vector.load %arg11[%c24_26, %c0_27] : memref<64x128xf32, #tpu.memory_space<vmem>>, vector<8x128xf32>
    tpu.vector_store %arg11[%c24_26, %c0_27], %28 {strides = array<i32>} : memref<64x128xf32, #tpu.memory_space<vmem>>, vector<8x128xf32>,
    %c32 = arith.constant 32 : index
    %c0_28 = arith.constant 0 : index
    %30 = vector.load %arg11[%c32, %c0_28] : memref<64x128xf32, #tpu.memory_space<vmem>>, vector<8x128xf32>
    %cst_29 = arith.constant dense<0.000000e+00> : vector<8x128xf32>
    %31 = tpu.matmul %28, %3, %cst_29 {dimension_numbers = #tpu.dot_dimension_numbers<[1], [0], [0], [1], [0, 0, 1, 1], [], []>} : vector<8x128xf32>, vector<128x128xf32>, vector<8x128xf32> -> vector<8x128xf32>
    %32 = arith.addf %30, %31 : vector<8x128xf32>
    %33 = math.tanh %32 : vector<8x128xf32>
    %c32_30 = arith.constant 32 : index
    %c0_31 = arith.constant 0 : index
    %34 = vector.load %arg11[%c32_30, %c0_31] : memref<64x128xf32, #tpu.memory_space<vmem>>, vector<8x128xf32>
    tpu.vector_store %arg11[%c32_30, %c0_31], %33 {strides = array<i32>} : memref<64x128xf32, #tpu.memory_space<vmem>>, vector<8x128xf32>,
    %c40 = arith.constant 40 : index
    %c0_32 = arith.constant 0 : index
    %35 = vector.load %arg11[%c40, %c0_32] : memref<64x128xf32, #tpu.memory_space<vmem>>, vector<8x128xf32>
    %cst_33 = arith.constant dense<0.000000e+00> : vector<8x128xf32>
    %36 = tpu.matmul %33, %3, %cst_33 {dimension_numbers = #tpu.dot_dimension_numbers<[1], [0], [0], [1], [0, 0, 1, 1], [], []>} : vector<8x128xf32>, vector<128x128xf32>, vector<8x128xf32> -> vector<8x128xf32>
    %37 = arith.addf %35, %36 : vector<8x128xf32>
    %38 = math.tanh %37 : vector<8x128xf32>
    %c40_34 = arith.constant 40 : index
    %c0_35 = arith.constant 0 : index
    %39 = vector.load %arg11[%c40_34, %c0_35] : memref<64x128xf32, #tpu.memory_space<vmem>>, vector<8x128xf32>
    tpu.vector_store %arg11[%c40_34, %c0_35], %38 {strides = array<i32>} : memref<64x128xf32, #tpu.memory_space<vmem>>, vector<8x128xf32>,
    %c48 = arith.constant 48 : index
    %c0_36 = arith.constant 0 : index
    %40 = vector.load %arg11[%c48, %c0_36] : memref<64x128xf32, #tpu.memory_space<vmem>>, vector<8x128xf32>
    %cst_37 = arith.constant dense<0.000000e+00> : vector<8x128xf32>
    %41 = tpu.matmul %38, %3, %cst_37 {dimension_numbers = #tpu.dot_dimension_numbers<[1], [0], [0], [1], [0, 0, 1, 1], [], []>} : vector<8x128xf32>, vector<128x128xf32>, vector<8x128xf32> -> vector<8x128xf32>
    %42 = arith.addf %40, %41 : vector<8x128xf32>
    %43 = math.tanh %42 : vector<8x128xf32>
    %c48_38 = arith.constant 48 : index
    %c0_39 = arith.constant 0 : index
    %44 = vector.load %arg11[%c48_38, %c0_39] : memref<64x128xf32, #tpu.memory_space<vmem>>, vector<8x128xf32>
    tpu.vector_store %arg11[%c48_38, %c0_39], %43 {strides = array<i32>} : memref<64x128xf32, #tpu.memory_space<vmem>>, vector<8x128xf32>,
    %c56 = arith.constant 56 : index
    %c0_40 = arith.constant 0 : index
    %45 = vector.load %arg11[%c56, %c0_40] : memref<64x128xf32, #tpu.memory_space<vmem>>, vector<8x128xf32>
    %cst_41 = arith.constant dense<0.000000e+00> : vector<8x128xf32>
    %46 = tpu.matmul %43, %3, %cst_41 {dimension_numbers = #tpu.dot_dimension_numbers<[1], [0], [0], [1], [0, 0, 1, 1], [], []>} : vector<8x128xf32>, vector<128x128xf32>, vector<8x128xf32> -> vector<8x128xf32>
    %47 = arith.addf %45, %46 : vector<8x128xf32>
    %48 = math.tanh %47 : vector<8x128xf32>
    %c56_42 = arith.constant 56 : index
    %c0_43 = arith.constant 0 : index
    %49 = vector.load %arg11[%c56_42, %c0_43] : memref<64x128xf32, #tpu.memory_space<vmem>>, vector<8x128xf32>
    tpu.vector_store %arg11[%c56_42, %c0_43], %48 {strides = array<i32>} : memref<64x128xf32, #tpu.memory_space<vmem>>, vector<8x128xf32>,
    %c0_44 = arith.constant 0 : index
    %c0_45 = arith.constant 0 : index
    %50 = vector.load %arg11[%c0_44, %c0_45] : memref<64x128xf32, #tpu.memory_space<vmem>>, vector<64x128xf32>
    %c0_46 = arith.constant 0 : index
    %c0_47 = arith.constant 0 : index
    %51 = vector.load %arg5[%c0_46, %c0_47] : memref<128x128xf32, #tpu.memory_space<vmem>>, vector<128x128xf32>
    %c0_48 = arith.constant 0 : index
    %c0_49 = arith.constant 0 : index
    %52 = vector.load %arg6[%c0_48, %c0_49] : memref<128x128xf32, #tpu.memory_space<vmem>>, vector<128x128xf32>
    %c0_50 = arith.constant 0 : index
    %c0_51 = arith.constant 0 : index
    %53 = vector.load %arg7[%c0_50, %c0_51] : memref<1x128xf32, #tpu.memory_space<vmem>>, vector<1x128xf32>
    %cst_52 = arith.constant dense<0.000000e+00> : vector<64x128xf32>
    %54 = tpu.matmul %50, %51, %cst_52 {dimension_numbers = #tpu.dot_dimension_numbers<[1], [0], [0], [1], [0, 0, 1, 1], [], []>} : vector<64x128xf32>, vector<128x128xf32>, vector<64x128xf32> -> vector<64x128xf32>
    %55 = vector.broadcast %53 : vector<1x128xf32> to vector<64x128xf32>
    %56 = arith.addf %54, %55 : vector<64x128xf32>
    %c0_53 = arith.constant 0 : index
    %c0_54 = arith.constant 0 : index
    %57 = vector.load %arg11[%c0_53, %c0_54] : memref<64x128xf32, #tpu.memory_space<vmem>>, vector<64x128xf32>
    tpu.vector_store %arg11[%c0_53, %c0_54], %56 {strides = array<i32>} : memref<64x128xf32, #tpu.memory_space<vmem>>, vector<64x128xf32>,
    %cst_55 = arith.constant 0.000000e+00 : f32
    %58 = vector.broadcast %cst_55 : f32 to vector<8x128xf32>
    %c0_56 = arith.constant 0 : index
    %c0_57 = arith.constant 0 : index
    %59 = vector.load %arg11[%c0_56, %c0_57] : memref<64x128xf32, #tpu.memory_space<vmem>>, vector<8x128xf32>
    %cst_58 = arith.constant dense<0.000000e+00> : vector<8x128xf32>
    %60 = tpu.matmul %58, %52, %cst_58 {dimension_numbers = #tpu.dot_dimension_numbers<[1], [0], [0], [1], [0, 0, 1, 1], [], []>} : vector<8x128xf32>, vector<128x128xf32>, vector<8x128xf32> -> vector<8x128xf32>
    %61 = arith.addf %59, %60 : vector<8x128xf32>
    %62 = math.tanh %61 : vector<8x128xf32>
    %c8_59 = arith.constant 8 : index
    %c0_60 = arith.constant 0 : index
    %63 = vector.load %arg11[%c8_59, %c0_60] : memref<64x128xf32, #tpu.memory_space<vmem>>, vector<8x128xf32>
    %cst_61 = arith.constant dense<0.000000e+00> : vector<8x128xf32>
    %64 = tpu.matmul %62, %52, %cst_61 {dimension_numbers = #tpu.dot_dimension_numbers<[1], [0], [0], [1], [0, 0, 1, 1], [], []>} : vector<8x128xf32>, vector<128x128xf32>, vector<8x128xf32> -> vector<8x128xf32>
    %65 = arith.addf %63, %64 : vector<8x128xf32>
    %66 = math.tanh %65 : vector<8x128xf32>
    %c16_62 = arith.constant 16 : index
    %c0_63 = arith.constant 0 : index
    %67 = vector.load %arg11[%c16_62, %c0_63] : memref<64x128xf32, #tpu.memory_space<vmem>>, vector<8x128xf32>
    %cst_64 = arith.constant dense<0.000000e+00> : vector<8x128xf32>
    %68 = tpu.matmul %66, %52, %cst_64 {dimension_numbers = #tpu.dot_dimension_numbers<[1], [0], [0], [1], [0, 0, 1, 1], [], []>} : vector<8x128xf32>, vector<128x128xf32>, vector<8x128xf32> -> vector<8x128xf32>
    %69 = arith.addf %67, %68 : vector<8x128xf32>
    %70 = math.tanh %69 : vector<8x128xf32>
    %c24_65 = arith.constant 24 : index
    %c0_66 = arith.constant 0 : index
    %71 = vector.load %arg11[%c24_65, %c0_66] : memref<64x128xf32, #tpu.memory_space<vmem>>, vector<8x128xf32>
    %cst_67 = arith.constant dense<0.000000e+00> : vector<8x128xf32>
    %72 = tpu.matmul %70, %52, %cst_67 {dimension_numbers = #tpu.dot_dimension_numbers<[1], [0], [0], [1], [0, 0, 1, 1], [], []>} : vector<8x128xf32>, vector<128x128xf32>, vector<8x128xf32> -> vector<8x128xf32>
    %73 = arith.addf %71, %72 : vector<8x128xf32>
    %74 = math.tanh %73 : vector<8x128xf32>
    %c32_68 = arith.constant 32 : index
    %c0_69 = arith.constant 0 : index
    %75 = vector.load %arg11[%c32_68, %c0_69] : memref<64x128xf32, #tpu.memory_space<vmem>>, vector<8x128xf32>
    %cst_70 = arith.constant dense<0.000000e+00> : vector<8x128xf32>
    %76 = tpu.matmul %74, %52, %cst_70 {dimension_numbers = #tpu.dot_dimension_numbers<[1], [0], [0], [1], [0, 0, 1, 1], [], []>} : vector<8x128xf32>, vector<128x128xf32>, vector<8x128xf32> -> vector<8x128xf32>
    %77 = arith.addf %75, %76 : vector<8x128xf32>
    %78 = math.tanh %77 : vector<8x128xf32>
    %c40_71 = arith.constant 40 : index
    %c0_72 = arith.constant 0 : index
    %79 = vector.load %arg11[%c40_71, %c0_72] : memref<64x128xf32, #tpu.memory_space<vmem>>, vector<8x128xf32>
    %cst_73 = arith.constant dense<0.000000e+00> : vector<8x128xf32>
    %80 = tpu.matmul %78, %52, %cst_73 {dimension_numbers = #tpu.dot_dimension_numbers<[1], [0], [0], [1], [0, 0, 1, 1], [], []>} : vector<8x128xf32>, vector<128x128xf32>, vector<8x128xf32> -> vector<8x128xf32>
    %81 = arith.addf %79, %80 : vector<8x128xf32>
    %82 = math.tanh %81 : vector<8x128xf32>
    %c48_74 = arith.constant 48 : index
    %c0_75 = arith.constant 0 : index
    %83 = vector.load %arg11[%c48_74, %c0_75] : memref<64x128xf32, #tpu.memory_space<vmem>>, vector<8x128xf32>
    %cst_76 = arith.constant dense<0.000000e+00> : vector<8x128xf32>
    %84 = tpu.matmul %82, %52, %cst_76 {dimension_numbers = #tpu.dot_dimension_numbers<[1], [0], [0], [1], [0, 0, 1, 1], [], []>} : vector<8x128xf32>, vector<128x128xf32>, vector<8x128xf32> -> vector<8x128xf32>
    %85 = arith.addf %83, %84 : vector<8x128xf32>
    %86 = math.tanh %85 : vector<8x128xf32>
    %c56_77 = arith.constant 56 : index
    %c0_78 = arith.constant 0 : index
    %87 = vector.load %arg11[%c56_77, %c0_78] : memref<64x128xf32, #tpu.memory_space<vmem>>, vector<8x128xf32>
    %cst_79 = arith.constant dense<0.000000e+00> : vector<8x128xf32>
    %88 = tpu.matmul %86, %52, %cst_79 {dimension_numbers = #tpu.dot_dimension_numbers<[1], [0], [0], [1], [0, 0, 1, 1], [], []>} : vector<8x128xf32>, vector<128x128xf32>, vector<8x128xf32> -> vector<8x128xf32>
    %89 = arith.addf %87, %88 : vector<8x128xf32>
    %90 = math.tanh %89 : vector<8x128xf32>
    %c0_80 = arith.constant 0 : index
    %c0_81 = arith.constant 0 : index
    %91 = vector.load %arg8[%c0_80, %c0_81] : memref<128x128xf32, #tpu.memory_space<vmem>>, vector<128x128xf32>
    %cst_82 = arith.constant dense<0.000000e+00> : vector<8x128xf32>
    %92 = tpu.matmul %90, %91, %cst_82 {dimension_numbers = #tpu.dot_dimension_numbers<[1], [0], [0], [1], [0, 0, 1, 1], [], []>} : vector<8x128xf32>, vector<128x128xf32>, vector<8x128xf32> -> vector<8x128xf32>
    %c0_83 = arith.constant 0 : index
    %c0_84 = arith.constant 0 : index
    %93 = vector.load %arg9[%c0_83, %c0_84] : memref<1x128xf32, #tpu.memory_space<vmem>>, vector<1x128xf32>
    %94 = vector.broadcast %93 : vector<1x128xf32> to vector<8x128xf32>
    %95 = arith.addf %92, %94 : vector<8x128xf32>
    %c0_85 = arith.constant 0 : index
    %c0_86 = arith.constant 0 : index
    %96 = vector.load %arg10[%c0_85, %c0_86] : memref<8x128xf32, #tpu.memory_space<vmem>>, vector<8x128xf32>
    tpu.vector_store %arg10[%c0_85, %c0_86], %95 {strides = array<i32>} : memref<8x128xf32, #tpu.memory_space<vmem>>, vector<8x128xf32>,
    return
  }
  func.func @transform_0(%arg0: i32) -> (i32, i32, i32) {
    %c0_i32 = arith.constant 0 : i32
    %c0_i32_0 = arith.constant 0 : i32
    %c0_i32_1 = arith.constant 0 : i32
    return %arg0, %c0_i32, %c0_i32_0 : i32, i32, i32
  }
  func.func @transform_1(%arg0: i32) -> (i32, i32) {
    %c0_i32 = arith.constant 0 : i32
    %c0_i32_0 = arith.constant 0 : i32
    %c0_i32_1 = arith.constant 0 : i32
    return %c0_i32, %c0_i32_0 : i32, i32
  }
  func.func @transform_2(%arg0: i32) -> (i32, i32) {
    %c0_i32 = arith.constant 0 : i32
    %c0_i32_0 = arith.constant 0 : i32
    %c0_i32_1 = arith.constant 0 : i32
    return %c0_i32, %c0_i32_0 : i32, i32
  }
  func.func @transform_3(%arg0: i32) -> (i32, i32) {
    %c0_i32 = arith.constant 0 : i32
    %c0_i32_0 = arith.constant 0 : i32
    %c0_i32_1 = arith.constant 0 : i32
    return %c0_i32, %c0_i32_0 : i32, i32
  }
  func.func @transform_4(%arg0: i32) -> (i32, i32) {
    %c0_i32 = arith.constant 0 : i32
    %c0_i32_0 = arith.constant 0 : i32
    %c0_i32_1 = arith.constant 0 : i32
    return %c0_i32, %c0_i32_0 : i32, i32
  }
  func.func @transform_5(%arg0: i32) -> (i32, i32) {
    %c0_i32 = arith.constant 0 : i32
    %c0_i32_0 = arith.constant 0 : i32
    %c0_i32_1 = arith.constant 0 : i32
    return %c0_i32, %c0_i32_0 : i32, i32
  }
  func.func @transform_6(%arg0: i32) -> (i32, i32) {
    %c0_i32 = arith.constant 0 : i32
    %c0_i32_0 = arith.constant 0 : i32
    %c0_i32_1 = arith.constant 0 : i32
    return %c0_i32, %c0_i32_0 : i32, i32
  }
  func.func @transform_7(%arg0: i32) -> (i32, i32) {
    %c0_i32 = arith.constant 0 : i32
    %c0_i32_0 = arith.constant 0 : i32
    %c0_i32_1 = arith.constant 0 : i32
    return %c0_i32, %c0_i32_0 : i32, i32
  }
  func.func @transform_8(%arg0: i32) -> (i32, i32) {
    %c0_i32 = arith.constant 0 : i32
    %c0_i32_0 = arith.constant 0 : i32
    %c0_i32_1 = arith.constant 0 : i32
    return %c0_i32, %c0_i32_0 : i32, i32
  }
  func.func @transform_9(%arg0: i32) -> (i32, i32) {
    %c0_i32 = arith.constant 0 : i32
    %c0_i32_0 = arith.constant 0 : i32
    return %arg0, %c0_i32 : i32, i32
  }
}

</mosaic_0001>

<bundles_post_ra>
// kernel: rnn_model_forward.1
= control target key start
LH: loop header
LB: loop body
LE: loop exit
PB: predicated region body
PF: predicated region fallthrough
CT: control target
= control target key end

     0   :  { %14 = vsyncpa [#allocation4], 0  ;;  %s3634_s0 = inlined_call_operand.vmem [shape: f32[1,64,16], index: 0, kind: input, shape index: {}]   ;;  %s3635_s1 = inlined_call_operand.vmem [shape: f32[16,128], index: 1, kind: input, shape index: {}]   ;;  %s3636_s2 = inlined_call_operand.vmem [shape: f32[128,128], index: 2, kind: input, shape index: {}]   ;;  %s3637_s3 = inlined_call_operand.vmem [shape: f32[1,128], index: 3, kind: input, shape index: {}]   ;;  %s3638_s4 = inlined_call_operand.hbm [shape: f32[128,128], index: 4, kind: input, shape index: {}]   ;;  %s3639_s5 = inlined_call_operand.hbm [shape: f32[128,128], index: 5, kind: input, shape index: {}]   ;;  %s3640_s6 = inlined_call_operand.vmem [shape: f32[1,128], index: 6, kind: input, shape index: {}]   ;;  %s3641_s7 = inlined_call_operand.hbm [shape: f32[128,128], index: 7, kind: input, shape index: {}]   ;;  %s3642_s8 = inlined_call_operand.vmem [shape: f32[1,128], index: 8, kind: input, shape index: {}]   ;;  %s3643_s9 = inlined_call_operand.vmem [shape: f32[8,128], index: 9, kind: output, shape index: {}]  }
   0x1   :  { %15 = vsyncpa [#allocation6], 0  ;;  %s2772_s30 = smov [#allocation5]   ;;  %s2773_s11 = smov [#allocation3]  }
   0x2   :  { %s41_s10 = sshll.u32 %s2772_s30, 4  ;;  %s29_s12 = sshll.u32 %s2773_s11, 4  ;;  %s42_s10 = int_to_ptr.vmem [resolvable:$true] %s41_s10  ;;  %s30_s12 = int_to_ptr.vmem [resolvable:$true] %s29_s12 }
   0x3   :  { %s2716_s13 = scalar_lea.vmem %s42_s10, 2048  ;;  %p2721_p1 = scmp.lt.s32.totalorder %s42_s10, %s42_s10 }
   0x4   :  { %p2717_p0 = scmp.ne.s32.totalorder %s42_s10, %s2716_s13  ;;  %p2722_p2 = scmp.lt.s32.totalorder %s2716_s13, %s2716_s13 }
   0x6   :  { %p2723_p3 = por %p2722_p2, %p2721_p1 }
   0x8   :  { %p2724_p4 = pnand %p2723_p3, %p2717_p0 }
   0xa   :  { %2727 = shalt.err (!%p2724_p4)
}
   0xb   :  { %s2774_s14 = smov 128   ;;  %s2775_s15 = smov 8  }
   0xc   :  { %47 = dma.hbm_to_vmem [thread:$0]  %s3639_s5, 2048, %s42_s10, [#allocation6], %s2774_s14, %s2774_s14, %s2775_s15  }
   0xd   :  { %s2736_s18 = scalar_lea.vmem %s30_s12, 2048  ;;  %p2741_p6 = scmp.lt.s32.totalorder %s30_s12, %s30_s12 }
   0xe   :  { %p2737_p5 = scmp.ne.s32.totalorder %s30_s12, %s2736_s18  ;;  %p2742_p7 = scmp.lt.s32.totalorder %s2736_s18, %s2736_s18 }
  0x10   :  { %p2743_p8 = por %p2742_p7, %p2741_p6 }
  0x12   :  { %p2744_p9 = pnand %p2743_p8, %p2737_p5 }
  0x14   :  { %2747 = shalt.err (!%p2744_p9)
}
  0x15   :  { %35 = dma.hbm_to_vmem [thread:$0]  %s3638_s4, 2048, %s30_s12, [#allocation4], %s2774_s14, %s2774_s14, %s2775_s15  }
  0x16   :  { %s2776_s21 = smov [#allocation7]  }
  0x17   :  { %s55_s22 = sshll.u32 %s2776_s21, 4  ;;  %s56_s22 = int_to_ptr.vmem [resolvable:$true] %s55_s22 }
  0x18   :  { %s2756_s23 = scalar_lea.vmem %s56_s22, 2048  ;;  %p2761_p11 = scmp.lt.s32.totalorder %s56_s22, %s56_s22 }
  0x19   :  { %p2757_p10 = scmp.ne.s32.totalorder %s56_s22, %s2756_s23  ;;  %p2762_p12 = scmp.lt.s32.totalorder %s2756_s23, %s2756_s23 }
  0x1b   :  { %p2763_p13 = por %p2762_p12, %p2761_p11 }
  0x1d   :  { %p2764_p0 = pnand %p2763_p13, %p2757_p10 }
  0x1f   :  { %2767 = shalt.err (!%p2764_p0)
}
  0x20   :  { %61 = dma.hbm_to_vmem [thread:$0]  %s3641_s7, 2048, %s56_s22, [#allocation6], %s2774_s14, %s2774_s14, %s2775_s15  }
  0x21   :  { %2768 = dma.done.wait [#allocation4], 2048  }
  0x22   :  { %2769 = vsyncadd [#allocation4], 4294965248 }
  0x23   :  { %2770 = dma.done.wait [#allocation6], 4096  }
  0x24   :  { %2771 = vsyncadd [#allocation6], 4294963200  ;;  %v2777_v0 = vmov 0.0   ;;  %vm2778_vm0 = vmmov 0   ;;  %v2844_v1 = vld [vmem:[%s3636_s2 + $0x78] sm:$0xff]  ;;  %v2849_v2 = vld [vmem:[%s3636_s2 + $0x70] sm:$0xff] }
  0x25   :  { %2030 = vmatprep.subr.mxu1 %v2777_v0  ;;  %2062 = vmatprep.mubr.msk.f32.mxu1 %vm2778_vm0, %v2777_v0  ;;  %v2856_v3 = vld [vmem:[%s3636_s2 + $0x68] sm:$0xff]  ;;  %v2866_v5 = vld [vmem:[%s3636_s2 + $0x60] sm:$0xff]  ;;  %vm106_vm1 = vcmask 130048   ;;  %v2879_v8 = vld [vmem:[%s3636_s2 + $0x58] sm:$0xff] }
  0x26   :  { %2031 = vmatpush3.msra.mxu1 %v2844_v1  ;;  %v82_v4 = vld [vmem:[%s3635_s1 + $0x8] sm:$0xff]  ;;  %v81_v6 = vld [vmem:[%s3635_s1] sm:$0xff]  ;;  %v2889_v10 = vld [vmem:[%s3636_s2 + $0x50] sm:$0xff] }
  0x27   :  { %2032 = vmatprep.subr.mxu1 %v2777_v0  ;;  %2014 = vmatprep.subr.mxu0 %v82_v4  ;;  %v73_v7 = vld [vmem:[%s3634_s0] sm:$0xff]  ;;  %v74_v9 = vld [vmem:[%s3634_s0 + $0x8] sm:$0xff]  ;;  %v2916_v13 = vld [vmem:[%s3636_s2 + $0x38] sm:$0xff] }
  0x28   :  { %2033 = vmatpush3.msra.mxu1 %v2849_v2  ;;  %2015 = vmatpush3.msra.mxu0 %v82_v4  ;;  %v2898_v11 = vld [vmem:[%s3636_s2 + $0x48] sm:$0xff]  ;;  %v2907_v12 = vld [vmem:[%s3636_s2 + $0x40] sm:$0xff]  ;;  %v2925_v14 = vld [vmem:[%s3636_s2 + $0x30] sm:$0xff] }
  0x29   :  { %2034 = vmatprep.subr.mxu1 %v2777_v0  ;;  %2016 = vmatprep.subr.mxu0 %v81_v6  ;;  %v2934_v15 = vld [vmem:[%s3636_s2 + $0x28] sm:$0xff]  ;;  %v2943_v16 = vld [vmem:[%s3636_s2 + $0x20] sm:$0xff]  ;;  %v2952_v17 = vld [vmem:[%s3636_s2 + $0x18] sm:$0xff] }
  0x2a   :  { %2035 = vmatpush3.msra.mxu1 %v2856_v3  ;;  %2017 = vmatpush3.msra.mxu0 %v81_v6  ;;  %v2961_v18 = vld [vmem:[%s3636_s2 + $0x10] sm:$0xff]  ;;  %v2970_v19 = vld [vmem:[%s3636_s2 + $0x8] sm:$0xff]  ;;  %v2979_v20 = vld [vmem:[%s3636_s2] sm:$0xff] }
  0x2b   :  { %2036 = vmatprep.subr.mxu1 %v2777_v0  ;;  %2018 = vmatprep.mubr.msk.f32.mxu0 %vm106_vm1, %v73_v7  ;;  %v75_v21 = vld [vmem:[%s3634_s0 + $0x10] sm:$0xff]  ;;  %v76_v22 = vld [vmem:[%s3634_s0 + $0x18] sm:$0xff]  ;;  %v77_v23 = vld [vmem:[%s3634_s0 + $0x20] sm:$0xff] }
  0x2c   :  { %2037 = vmatpush3.msra.mxu1 %v2866_v5  ;;  %2019 = vmatmul.mubr.msk.f32.vlgmr.msra.gmra.mxu0 %vm106_vm1, %v74_v9  ;;  %v78_v24 = vld [vmem:[%s3634_s0 + $0x28] sm:$0xff]  ;;  %v79_v25 = vld [vmem:[%s3634_s0 + $0x30] sm:$0xff]  ;;  %v80_v26 = vld [vmem:[%s3634_s0 + $0x38] sm:$0xff] }
  0x2d   :  { %2038 = vmatprep.subr.mxu1 %v2777_v0  ;;  %2065 = vmatprep.subr.mxu0 %v2777_v0  ;;  %v3064_v28 = vld [vmem:[%s3637_s3] ss:$0 sm:$0xff]  ;;  %v859_v61 = vld [vmem:[#allocation3 + $0x78] sm:$0xff]  ;;  %v858_v4 = vld [vmem:[#allocation3 + $0x70] sm:$0xff] }
  0x2e   :  { %2039 = vmatpush3.msra.mxu1 %v2879_v8  ;;  %2066 = vmatpush3.msra.mxu0 %v2844_v1  ;;  %v856_v6 = vld [vmem:[#allocation3 + $0x60] sm:$0xff]  ;;  %v855_v7 = vld [vmem:[#allocation3 + $0x58] sm:$0xff]  ;;  %v853_v9 = vld [vmem:[#allocation3 + $0x48] sm:$0xff] }
  0x2f   :  { %2040 = vmatprep.subr.mxu1 %v2777_v0  ;;  %2067 = vmatprep.subr.mxu0 %v2777_v0 }
  0x30   :  { %2041 = vmatpush3.msra.mxu1 %v2889_v10  ;;  %2068 = vmatpush3.msra.mxu0 %v2849_v2 }
  0x31   :  { %2042 = vmatprep.subr.mxu1 %v2777_v0  ;;  %2069 = vmatprep.subr.mxu0 %v2777_v0 }
  0x32   :  { %2043 = vmatpush3.msra.mxu1 %v2898_v11  ;;  %2070 = vmatpush3.msra.mxu0 %v2856_v3 }
  0x33   :  { %2044 = vmatprep.subr.mxu1 %v2777_v0  ;;  %2071 = vmatprep.subr.mxu0 %v2777_v0 }
  0x34   :  { %2045 = vmatpush3.msra.mxu1 %v2907_v12  ;;  %2072 = vmatpush3.msra.mxu0 %v2866_v5 }
  0x35   :  { %2046 = vmatprep.subr.mxu1 %v2777_v0  ;;  %2073 = vmatprep.subr.mxu0 %v2777_v0 }
  0x36   :  { %2047 = vmatpush3.msra.mxu1 %v2916_v13  ;;  %2074 = vmatpush3.msra.mxu0 %v2879_v8 }
  0x37   :  { %2048 = vmatprep.subr.mxu1 %v2777_v0  ;;  %2075 = vmatprep.subr.mxu0 %v2777_v0 }
  0x38   :  { %2049 = vmatpush3.msra.mxu1 %v2925_v14  ;;  %2076 = vmatpush3.msra.mxu0 %v2889_v10 }
  0x39   :  { %2050 = vmatprep.subr.mxu1 %v2777_v0  ;;  %2077 = vmatprep.subr.mxu0 %v2777_v0 }
  0x3a   :  { %2051 = vmatpush3.msra.mxu1 %v2934_v15  ;;  %2078 = vmatpush3.msra.mxu0 %v2898_v11 }
  0x3b   :  { %2052 = vmatprep.subr.mxu1 %v2777_v0  ;;  %2079 = vmatprep.subr.mxu0 %v2777_v0 }
  0x3c   :  { %2053 = vmatpush3.msra.mxu1 %v2943_v16  ;;  %2080 = vmatpush3.msra.mxu0 %v2907_v12 }
  0x3d   :  { %2054 = vmatprep.subr.mxu1 %v2777_v0  ;;  %2081 = vmatprep.subr.mxu0 %v2777_v0 }
  0x3e   :  { %2055 = vmatpush3.msra.mxu1 %v2952_v17  ;;  %2082 = vmatpush3.msra.mxu0 %v2916_v13 }
  0x3f   :  { %2056 = vmatprep.subr.mxu1 %v2777_v0  ;;  %2083 = vmatprep.subr.mxu0 %v2777_v0 }
  0x40   :  { %2057 = vmatpush3.msra.mxu1 %v2961_v18  ;;  %2084 = vmatpush3.msra.mxu0 %v2925_v14 }
  0x41   :  { %2058 = vmatprep.subr.mxu1 %v2777_v0  ;;  %2085 = vmatprep.subr.mxu0 %v2777_v0 }
  0x42   :  { %2059 = vmatpush3.msra.mxu1 %v2970_v19  ;;  %2086 = vmatpush3.msra.mxu0 %v2934_v15 }
  0x43   :  { %2060 = vmatprep.subr.mxu1 %v2777_v0  ;;  %2087 = vmatprep.subr.mxu0 %v2777_v0 }
  0x44   :  { %2061 = vmatpush3.msra.mxu1 %v2979_v20  ;;  %2088 = vmatpush3.msra.mxu0 %v2943_v16 }
  0x45   :  { %2063 = vmatmul.mubr.f32.vlgmr.msra.gmra.mxu1 %v2777_v0  ;;  %2100 = vmatprep.subr.mxu1 %v2777_v0 }
  0x46   :  { %2089 = vmatprep.subr.mxu0 %v2777_v0  ;;  %2101 = vmatpush3.msra.mxu1 %v2844_v1 }
  0x47   :  { %2090 = vmatpush3.msra.mxu0 %v2952_v17  ;;  %2102 = vmatprep.subr.mxu1 %v2777_v0 }
  0x48   :  { %2091 = vmatprep.subr.mxu0 %v2777_v0  ;;  %2103 = vmatpush3.msra.mxu1 %v2849_v2 }
  0x49   :  { %2092 = vmatpush3.msra.mxu0 %v2961_v18  ;;  %2104 = vmatprep.subr.mxu1 %v2777_v0 }
  0x4a   :  { %2093 = vmatprep.subr.mxu0 %v2777_v0  ;;  %2105 = vmatpush3.msra.mxu1 %v2856_v3 }
  0x4b   :  { %2094 = vmatpush3.msra.mxu0 %v2970_v19  ;;  %2106 = vmatprep.subr.mxu1 %v2777_v0 }
  0x4c   :  { %2095 = vmatprep.subr.mxu0 %v2777_v0  ;;  %2107 = vmatpush3.msra.mxu1 %v2866_v5 }
  0x4d   :  { %2096 = vmatpush3.msra.mxu0 %v2979_v20  ;;  %2108 = vmatprep.subr.mxu1 %v2777_v0 }
  0x4e   :  { %2109 = vmatpush3.msra.mxu1 %v2879_v8  ;;  %2132 = vmatprep.mubr.msk.f32.mxu1 %vm2778_vm0, %v2777_v0 }
  0x4f   :  { %2110 = vmatprep.subr.mxu1 %v2777_v0  ;;  %2135 = vmatprep.subr.mxu0 %v2777_v0 }
  0x50   :  { %2111 = vmatpush3.msra.mxu1 %v2889_v10  ;;  %2021 = vmatprep.mubr.msk.f32.mxu0 %vm106_vm1, %v75_v21  ;;  %v3282_v21 = vld [vmem:[#allocation5 + $0x68] sm:$0xff] }
  0x51   :  { %2112 = vmatprep.subr.mxu1 %v2777_v0  ;;  %2022 = vmatmul.mubr.msk.f32.gmra.mxu0 %vm106_vm1, %v76_v22  ;;  %v3286_v22 = vld [vmem:[#allocation5 + $0x60] sm:$0xff] }
  0x52   :  { %2113 = vmatpush3.msra.mxu1 %v2898_v11  ;;  %2024 = vmatprep.mubr.msk.f32.mxu0 %vm106_vm1, %v77_v23  ;;  %v3290_v23 = vld [vmem:[#allocation5 + $0x58] sm:$0xff] }
  0x53   :  { %2114 = vmatprep.subr.mxu1 %v2777_v0 }
  0x54   :  { %2115 = vmatpush3.msra.mxu1 %v2907_v12 }
  0x55   :  { %2116 = vmatprep.subr.mxu1 %v2777_v0  ;;  %2025 = vmatmul.mubr.msk.f32.gmra.mxu0 %vm106_vm1, %v78_v24  ;;  %v3294_v24 = vld [vmem:[#allocation5 + $0x50] sm:$0xff] }
  0x56   :  { %2117 = vmatpush3.msra.mxu1 %v2916_v13  ;;  %2027 = vmatprep.mubr.msk.f32.mxu0 %vm106_vm1, %v79_v25  ;;  %v3298_v25 = vld [vmem:[#allocation5 + $0x48] sm:$0xff] }
  0x57   :  { %2118 = vmatprep.subr.mxu1 %v2777_v0 }
  0x58   :  { %2119 = vmatpush3.msra.mxu1 %v2925_v14 }
  0x59   :  { %2120 = vmatprep.subr.mxu1 %v2777_v0  ;;  %2028 = vmatmul.mubr.msk.f32.gmra.mxu0 %vm106_vm1, %v80_v26  ;;  %v3302_v26 = vld [vmem:[#allocation5 + $0x40] sm:$0xff] }
  0x5a   :  { %2121 = vmatpush3.msra.mxu1 %v2934_v15  ;;  %2097 = vmatprep.mubr.msk.f32.mxu0 %vm2778_vm0, %v2777_v0 }
  0x5b   :  { %2122 = vmatprep.subr.mxu1 %v2777_v0 }
  0x5c   :  { %2123 = vmatpush3.msra.mxu1 %v2943_v16 }
  0x5d   :  { %2124 = vmatprep.subr.mxu1 %v2777_v0 }
  0x5e   :  { %2125 = vmatpush3.msra.mxu1 %v2952_v17 }
  0x5f   :  { %2126 = vmatprep.subr.mxu1 %v2777_v0 }
  0x60   :  { %2127 = vmatpush3.msra.mxu1 %v2961_v18 }
  0x61   :  { %2128 = vmatprep.subr.mxu1 %v2777_v0 }
  0x62   :  { %2129 = vmatpush3.msra.mxu1 %v2970_v19 }
  0x63   :  { %2130 = vmatprep.subr.mxu1 %v2777_v0 }
  0x64   :  { %2131 = vmatpush3.msra.mxu1 %v2979_v20 }
  0x65   :  { %2170 = vmatprep.subr.mxu1 %v2777_v0 }
  0xec   :  { %v2020_v27 = vpop.f32.mrf.mxu0 }
  0xed   :  { %v203_v41 = vadd.f32 %v2020_v27, %v3064_v28  ;;  %v3306_v27 = vld [vmem:[#allocation5 + $0x38] sm:$0xff] }
  0xee   :  { %v197_v29 = vpop.f32.mrf.mxu0 }
  0xef   :  { %v198_v30 = vadd.f32 %v3064_v28, %v197_v29  ;;  %v3310_v29 = vld [vmem:[#allocation5 + $0x30] sm:$0xff] }
 0x105   :  { %v311_v31 = vpop.f32.mrf.mxu1 }
 0x106   :  { %v315_v32 = vadd.f32 %v311_v31, %v198_v30  ;;  %v3314_v30 = vld [vmem:[#allocation5 + $0x28] sm:$0xff]  ;;  %v3318_v31 = vld [vmem:[#allocation5 + $0x20] sm:$0xff] }
 0x107   :  { %v2064_v33 = vpop.f32.mrf.mxu1 }
 0x108   :  { %2676 = vtanh.f32 %v315_v32  ;;  %v3322_v32 = vld [vmem:[#allocation5 + $0x18] sm:$0xff]  ;;  %v3326_v33 = vld [vmem:[#allocation5 + $0x10] sm:$0xff] }
 0x111   :  { %v3104_v35 = vpop.f32.mrf.mxu0 }
 0x112   :  { %v213_v51 = vadd.f32 %v3104_v35, %v3064_v28  ;;  %v3334_v35 = vld [vmem:[#allocation5] sm:$0xff] }
 0x113   :  { %v207_v36 = vpop.f32.mrf.mxu0 }
 0x114   :  { %v208_v46 = vadd.f32 %v3064_v28, %v207_v36 }
 0x115   :  { %v3067_v34 = vpop.eup %2676  ;;  %v3106_v37 = vpop.f32.mrf.mxu0 }
 0x116   :  { %2098 = vmatmul.mubr.f32.vlgmr.msra.gmra.mxu0 %v3067_v34  ;;  %v223_v62 = vadd.f32 %v3106_v37, %v3064_v28 }
 0x117   :  { %2136 = vmatpush3.msra.mxu0 %v2844_v1  ;;  %2167 = vmatprep.mubr.msk.f32.mxu0 %vm2778_vm0, %v2777_v0  ;;  %v3108_v38 = vpop.f32.mrf.mxu0 }
 0x118   :  { %2137 = vmatprep.subr.mxu0 %v2777_v0  ;;  %v218_v56 = vadd.f32 %v3064_v28, %v3108_v38 }
 0x119   :  { %2138 = vmatpush3.msra.mxu0 %v2849_v2  ;;  %v3110_v39 = vpop.f32.mrf.mxu0 }
 0x11a   :  { %2139 = vmatprep.subr.mxu0 %v2777_v0 }
 0x11b   :  { %2140 = vmatpush3.msra.mxu0 %v2856_v3  ;;  %v3112_v40 = vpop.f32.mrf.mxu0 }
 0x11c   :  { %2141 = vmatprep.subr.mxu0 %v2777_v0  ;;  %v228_v36 = vadd.f32 %v3064_v28, %v3112_v40  ;;  %v233_v40 = vadd.f32 %v3110_v39, %v3064_v28 }
 0x11d   :  { %2142 = vmatpush3.msra.mxu0 %v2866_v5 }
 0x11e   :  { %2143 = vmatprep.subr.mxu0 %v2777_v0 }
 0x11f   :  { %2144 = vmatpush3.msra.mxu0 %v2879_v8 }
 0x120   :  { %2145 = vmatprep.subr.mxu0 %v2777_v0 }
 0x121   :  { %2146 = vmatpush3.msra.mxu0 %v2889_v10 }
 0x122   :  { %2147 = vmatprep.subr.mxu0 %v2777_v0 }
 0x123   :  { %2148 = vmatpush3.msra.mxu0 %v2898_v11 }
 0x124   :  { %2149 = vmatprep.subr.mxu0 %v2777_v0 }
 0x125   :  { %2150 = vmatpush3.msra.mxu0 %v2907_v12 }
 0x126   :  { %2151 = vmatprep.subr.mxu0 %v2777_v0 }
 0x127   :  { %2152 = vmatpush3.msra.mxu0 %v2916_v13 }
 0x128   :  { %2153 = vmatprep.subr.mxu0 %v2777_v0 }
 0x129   :  { %2154 = vmatpush3.msra.mxu0 %v2925_v14 }
 0x12a   :  { %2155 = vmatprep.subr.mxu0 %v2777_v0 }
 0x12b   :  { %2156 = vmatpush3.msra.mxu0 %v2934_v15 }
 0x12c   :  { %2157 = vmatprep.subr.mxu0 %v2777_v0 }
 0x12d   :  { %2158 = vmatpush3.msra.mxu0 %v2943_v16 }
 0x12e   :  { %2159 = vmatprep.subr.mxu0 %v2777_v0 }
 0x12f   :  { %2160 = vmatpush3.msra.mxu0 %v2952_v17 }
 0x130   :  { %2161 = vmatprep.subr.mxu0 %v2777_v0 }
 0x131   :  { %2162 = vmatpush3.msra.mxu0 %v2961_v18 }
 0x132   :  { %2163 = vmatprep.subr.mxu0 %v2777_v0 }
 0x133   :  { %2164 = vmatpush3.msra.mxu0 %v2970_v19 }
 0x134   :  { %2165 = vmatprep.subr.mxu0 %v2777_v0 }
 0x135   :  { %2166 = vmatpush3.msra.mxu0 %v2979_v20 }
 0x136   :  { %2205 = vmatprep.subr.mxu0 %v2777_v0 }
 0x1d6   :  { %v385_v42 = vpop.f32.mrf.mxu0 }
 0x1d7   :  { %v389_v43 = vadd.f32 %v385_v42, %v203_v41 }
 0x1d8   :  { %v2099_v44 = vpop.f32.mrf.mxu0 }
 0x1d9   :  { %2678 = vtanh.f32 %v389_v43 }
 0x1e6   :  { %v3115_v45 = vpop.eup %2678 }
 0x1e7   :  { %2133 = vmatmul.mubr.f32.vlgmr.msra.gmra.mxu1 %v3115_v45 }
 0x1e8   :  { %2171 = vmatpush3.msra.mxu1 %v2844_v1  ;;  %2202 = vmatprep.mubr.msk.f32.mxu1 %vm2778_vm0, %v2777_v0 }
 0x1e9   :  { %2172 = vmatprep.subr.mxu1 %v2777_v0 }
 0x1ea   :  { %2173 = vmatpush3.msra.mxu1 %v2849_v2 }
 0x1eb   :  { %2174 = vmatprep.subr.mxu1 %v2777_v0 }
 0x1ec   :  { %2175 = vmatpush3.msra.mxu1 %v2856_v3 }
 0x1ed   :  { %2176 = vmatprep.subr.mxu1 %v2777_v0 }
 0x1ee   :  { %2177 = vmatpush3.msra.mxu1 %v2866_v5 }
 0x1ef   :  { %2178 = vmatprep.subr.mxu1 %v2777_v0 }
 0x1f0   :  { %2179 = vmatpush3.msra.mxu1 %v2879_v8 }
 0x1f1   :  { %2180 = vmatprep.subr.mxu1 %v2777_v0 }
 0x1f2   :  { %2181 = vmatpush3.msra.mxu1 %v2889_v10 }
 0x1f3   :  { %2182 = vmatprep.subr.mxu1 %v2777_v0 }
 0x1f4   :  { %2183 = vmatpush3.msra.mxu1 %v2898_v11 }
 0x1f5   :  { %2184 = vmatprep.subr.mxu1 %v2777_v0 }
 0x1f6   :  { %2185 = vmatpush3.msra.mxu1 %v2907_v12 }
 0x1f7   :  { %2186 = vmatprep.subr.mxu1 %v2777_v0 }
 0x1f8   :  { %2187 = vmatpush3.msra.mxu1 %v2916_v13 }
 0x1f9   :  { %2188 = vmatprep.subr.mxu1 %v2777_v0 }
 0x1fa   :  { %2189 = vmatpush3.msra.mxu1 %v2925_v14 }
 0x1fb   :  { %2190 = vmatprep.subr.mxu1 %v2777_v0 }
 0x1fc   :  { %2191 = vmatpush3.msra.mxu1 %v2934_v15 }
 0x1fd   :  { %2192 = vmatprep.subr.mxu1 %v2777_v0 }
 0x1fe   :  { %2193 = vmatpush3.msra.mxu1 %v2943_v16 }
 0x1ff   :  { %2194 = vmatprep.subr.mxu1 %v2777_v0 }
 0x200   :  { %2195 = vmatpush3.msra.mxu1 %v2952_v17 }
 0x201   :  { %2196 = vmatprep.subr.mxu1 %v2777_v0 }
 0x202   :  { %2197 = vmatpush3.msra.mxu1 %v2961_v18 }
 0x203   :  { %2198 = vmatprep.subr.mxu1 %v2777_v0 }
 0x204   :  { %2199 = vmatpush3.msra.mxu1 %v2970_v19 }
 0x205   :  { %2200 = vmatprep.subr.mxu1 %v2777_v0 }
 0x206   :  { %2201 = vmatpush3.msra.mxu1 %v2979_v20 }
 0x207   :  { %2240 = vmatprep.subr.mxu1 %v2777_v0 }
 0x2a7   :  { %v459_v47 = vpop.f32.mrf.mxu1 }
 0x2a8   :  { %v463_v48 = vadd.f32 %v459_v47, %v208_v46 }
 0x2a9   :  { %v2134_v49 = vpop.f32.mrf.mxu1 }
 0x2aa   :  { %2680 = vtanh.f32 %v463_v48  ;;  %v3417_v49 = vld [vmem:[%s3640_s6] ss:$0 sm:$0xff] }
 0x2b7   :  { %v3153_v50 = vpop.eup %2680 }
 0x2b8   :  { %2168 = vmatmul.mubr.f32.vlgmr.msra.gmra.mxu0 %v3153_v50 }
 0x2b9   :  { %2206 = vmatpush3.msra.mxu0 %v2844_v1  ;;  %2237 = vmatprep.mubr.msk.f32.mxu0 %vm2778_vm0, %v2777_v0 }
 0x2ba   :  { %2207 = vmatprep.subr.mxu0 %v2777_v0 }
 0x2bb   :  { %2208 = vmatpush3.msra.mxu0 %v2849_v2 }
 0x2bc   :  { %2209 = vmatprep.subr.mxu0 %v2777_v0 }
 0x2bd   :  { %2210 = vmatpush3.msra.mxu0 %v2856_v3 }
 0x2be   :  { %2211 = vmatprep.subr.mxu0 %v2777_v0 }
 0x2bf   :  { %2212 = vmatpush3.msra.mxu0 %v2866_v5 }
 0x2c0   :  { %2213 = vmatprep.subr.mxu0 %v2777_v0 }
 0x2c1   :  { %2214 = vmatpush3.msra.mxu0 %v2879_v8 }
 0x2c2   :  { %2215 = vmatprep.subr.mxu0 %v2777_v0 }
 0x2c3   :  { %2216 = vmatpush3.msra.mxu0 %v2889_v10 }
 0x2c4   :  { %2217 = vmatprep.subr.mxu0 %v2777_v0 }
 0x2c5   :  { %2218 = vmatpush3.msra.mxu0 %v2898_v11 }
 0x2c6   :  { %2219 = vmatprep.subr.mxu0 %v2777_v0 }
 0x2c7   :  { %2220 = vmatpush3.msra.mxu0 %v2907_v12 }
 0x2c8   :  { %2221 = vmatprep.subr.mxu0 %v2777_v0 }
 0x2c9   :  { %2222 = vmatpush3.msra.mxu0 %v2916_v13 }
 0x2ca   :  { %2223 = vmatprep.subr.mxu0 %v2777_v0 }
 0x2cb   :  { %2224 = vmatpush3.msra.mxu0 %v2925_v14 }
 0x2cc   :  { %2225 = vmatprep.subr.mxu0 %v2777_v0 }
 0x2cd   :  { %2226 = vmatpush3.msra.mxu0 %v2934_v15 }
 0x2ce   :  { %2227 = vmatprep.subr.mxu0 %v2777_v0 }
 0x2cf   :  { %2228 = vmatpush3.msra.mxu0 %v2943_v16 }
 0x2d0   :  { %2229 = vmatprep.subr.mxu0 %v2777_v0 }
 0x2d1   :  { %2230 = vmatpush3.msra.mxu0 %v2952_v17 }
 0x2d2   :  { %2231 = vmatprep.subr.mxu0 %v2777_v0 }
 0x2d3   :  { %2232 = vmatpush3.msra.mxu0 %v2961_v18 }
 0x2d4   :  { %2233 = vmatprep.subr.mxu0 %v2777_v0 }
 0x2d5   :  { %2234 = vmatpush3.msra.mxu0 %v2970_v19 }
 0x2d6   :  { %2235 = vmatprep.subr.mxu0 %v2777_v0 }
 0x2d7   :  { %2236 = vmatpush3.msra.mxu0 %v2979_v20 }
 0x2d8   :  { %2275 = vmatprep.subr.mxu0 %v2777_v0 }
 0x378   :  { %v533_v52 = vpop.f32.mrf.mxu0 }
 0x379   :  { %v537_v53 = vadd.f32 %v533_v52, %v213_v51 }
 0x37a   :  { %v2169_v54 = vpop.f32.mrf.mxu0 }
 0x37b   :  { %2682 = vtanh.f32 %v537_v53 }
 0x388   :  { %v3192_v55 = vpop.eup %2682 }
 0x389   :  { %2203 = vmatmul.mubr.f32.vlgmr.msra.gmra.mxu1 %v3192_v55 }
 0x38a   :  { %2241 = vmatpush3.msra.mxu1 %v2844_v1  ;;  %2272 = vmatprep.mubr.msk.f32.mxu1 %vm2778_vm0, %v2777_v0 }
 0x38b   :  { %2242 = vmatprep.subr.mxu1 %v2777_v0 }
 0x38c   :  { %2243 = vmatpush3.msra.mxu1 %v2849_v2 }
 0x38d   :  { %2244 = vmatprep.subr.mxu1 %v2777_v0 }
 0x38e   :  { %2245 = vmatpush3.msra.mxu1 %v2856_v3 }
 0x38f   :  { %2246 = vmatprep.subr.mxu1 %v2777_v0 }
 0x390   :  { %2247 = vmatpush3.msra.mxu1 %v2866_v5 }
 0x391   :  { %2248 = vmatprep.subr.mxu1 %v2777_v0 }
 0x392   :  { %2249 = vmatpush3.msra.mxu1 %v2879_v8 }
 0x393   :  { %2250 = vmatprep.subr.mxu1 %v2777_v0 }
 0x394   :  { %2251 = vmatpush3.msra.mxu1 %v2889_v10 }
 0x395   :  { %2252 = vmatprep.subr.mxu1 %v2777_v0 }
 0x396   :  { %2253 = vmatpush3.msra.mxu1 %v2898_v11 }
 0x397   :  { %2254 = vmatprep.subr.mxu1 %v2777_v0 }
 0x398   :  { %2255 = vmatpush3.msra.mxu1 %v2907_v12 }
 0x399   :  { %2256 = vmatprep.subr.mxu1 %v2777_v0 }
 0x39a   :  { %2257 = vmatpush3.msra.mxu1 %v2916_v13 }
 0x39b   :  { %2258 = vmatprep.subr.mxu1 %v2777_v0 }
 0x39c   :  { %2259 = vmatpush3.msra.mxu1 %v2925_v14 }
 0x39d   :  { %2260 = vmatprep.subr.mxu1 %v2777_v0 }
 0x39e   :  { %2261 = vmatpush3.msra.mxu1 %v2934_v15 }
 0x39f   :  { %2262 = vmatprep.subr.mxu1 %v2777_v0 }
 0x3a0   :  { %2263 = vmatpush3.msra.mxu1 %v2943_v16 }
 0x3a1   :  { %2264 = vmatprep.subr.mxu1 %v2777_v0 }
 0x3a2   :  { %2265 = vmatpush3.msra.mxu1 %v2952_v17 }
 0x3a3   :  { %2266 = vmatprep.subr.mxu1 %v2777_v0 }
 0x3a4   :  { %2267 = vmatpush3.msra.mxu1 %v2961_v18 }
 0x3a5   :  { %2268 = vmatprep.subr.mxu1 %v2777_v0 }
 0x3a6   :  { %2269 = vmatpush3.msra.mxu1 %v2970_v19 }
 0x3a7   :  { %2270 = vmatprep.subr.mxu1 %v2777_v0 }
 0x3a8   :  { %2271 = vmatpush3.msra.mxu1 %v2979_v20 }
 0x3a9   :  { %2310 = vmatprep.subr.mxu1 %v859_v61 }
 0x449   :  { %v607_v57 = vpop.f32.mrf.mxu1 }
 0x44a   :  { %v611_v58 = vadd.f32 %v607_v57, %v218_v56 }
 0x44b   :  { %v2204_v59 = vpop.f32.mrf.mxu1 }
 0x44c   :  { %2684 = vtanh.f32 %v611_v58 }
 0x459   :  { %v3230_v60 = vpop.eup %2684 }
 0x45a   :  { %2238 = vmatmul.mubr.f32.vlgmr.msra.gmra.mxu0 %v3230_v60 }
 0x45b   :  { %2276 = vmatpush3.msra.mxu0 %v2844_v1  ;;  %2307 = vmatprep.mubr.msk.f32.mxu0 %vm2778_vm0, %v2777_v0 }
 0x45c   :  { %2277 = vmatprep.subr.mxu0 %v2777_v0 }
 0x45d   :  { %2278 = vmatpush3.msra.mxu0 %v2849_v2 }
 0x45e   :  { %2279 = vmatprep.subr.mxu0 %v2777_v0 }
 0x45f   :  { %2280 = vmatpush3.msra.mxu0 %v2856_v3 }
 0x460   :  { %2281 = vmatprep.subr.mxu0 %v2777_v0 }
 0x461   :  { %2282 = vmatpush3.msra.mxu0 %v2866_v5  ;;  %v857_v5 = vld [vmem:[#allocation3 + $0x68] sm:$0xff] }
 0x462   :  { %2283 = vmatprep.subr.mxu0 %v2777_v0 }
 0x463   :  { %2284 = vmatpush3.msra.mxu0 %v2879_v8  ;;  %v854_v8 = vld [vmem:[#allocation3 + $0x50] sm:$0xff] }
 0x464   :  { %2285 = vmatprep.subr.mxu0 %v2777_v0 }
 0x465   :  { %2286 = vmatpush3.msra.mxu0 %v2889_v10  ;;  %v852_v10 = vld [vmem:[#allocation3 + $0x40] sm:$0xff] }
 0x466   :  { %2287 = vmatprep.subr.mxu0 %v2777_v0 }
 0x467   :  { %2288 = vmatpush3.msra.mxu0 %v2898_v11  ;;  %v851_v11 = vld [vmem:[#allocation3 + $0x38] sm:$0xff] }
 0x468   :  { %2289 = vmatprep.subr.mxu0 %v2777_v0 }
 0x469   :  { %2290 = vmatpush3.msra.mxu0 %v2907_v12  ;;  %v850_v12 = vld [vmem:[#allocation3 + $0x30] sm:$0xff] }
 0x46a   :  { %2291 = vmatprep.subr.mxu0 %v2777_v0 }
 0x46b   :  { %2292 = vmatpush3.msra.mxu0 %v2916_v13  ;;  %v849_v13 = vld [vmem:[#allocation3 + $0x28] sm:$0xff] }
 0x46c   :  { %2293 = vmatprep.subr.mxu0 %v2777_v0 }
 0x46d   :  { %2294 = vmatpush3.msra.mxu0 %v2925_v14  ;;  %v848_v14 = vld [vmem:[#allocation3 + $0x20] sm:$0xff] }
 0x46e   :  { %2295 = vmatprep.subr.mxu0 %v2777_v0 }
 0x46f   :  { %2296 = vmatpush3.msra.mxu0 %v2934_v15  ;;  %v847_v15 = vld [vmem:[#allocation3 + $0x18] sm:$0xff] }
 0x470   :  { %2297 = vmatprep.subr.mxu0 %v2777_v0 }
 0x471   :  { %2298 = vmatpush3.msra.mxu0 %v2943_v16  ;;  %v846_v16 = vld [vmem:[#allocation3 + $0x10] sm:$0xff] }
 0x472   :  { %2299 = vmatprep.subr.mxu0 %v2777_v0 }
 0x473   :  { %2300 = vmatpush3.msra.mxu0 %v2952_v17  ;;  %v845_v17 = vld [vmem:[#allocation3 + $0x8] sm:$0xff] }
 0x474   :  { %2301 = vmatprep.subr.mxu0 %v2777_v0 }
 0x475   :  { %2302 = vmatpush3.msra.mxu0 %v2961_v18  ;;  %v844_v18 = vld [vmem:[#allocation3] sm:$0xff] }
 0x476   :  { %2303 = vmatprep.subr.mxu0 %v2777_v0 }
 0x477   :  { %2304 = vmatpush3.msra.mxu0 %v2970_v19  ;;  %v3275_v19 = vld [vmem:[#allocation5 + $0x78] sm:$0xff] }
 0x478   :  { %2305 = vmatprep.subr.mxu0 %v2777_v0 }
 0x479   :  { %2306 = vmatpush3.msra.mxu0 %v2979_v20  ;;  %v3278_v20 = vld [vmem:[#allocation5 + $0x70] sm:$0xff] }
 0x47a   :  { %2354 = vmatprep.subr.mxu0 %v2777_v0 }
 0x51a   :  { %v681_v63 = vpop.f32.mrf.mxu0 }
 0x51b   :  { %v685_v1 = vadd.f32 %v681_v63, %v223_v62 }
 0x51c   :  { %v2239_v2 = vpop.f32.mrf.mxu0 }
 0x51d   :  { %2686 = vtanh.f32 %v685_v1 }
 0x52a   :  { %v2687_v3 = vpop.eup %2686 }
 0x52b   :  { %2273 = vmatmul.mubr.f32.vlgmr.msra.gmra.mxu1 %v2687_v3 }
 0x52c   :  { %2311 = vmatpush3.msra.mxu1 %v859_v61  ;;  %2342 = vmatprep.mubr.f32.mxu1 %v3067_v34  ;;  %v3330_v34 = vld [vmem:[#allocation5 + $0x8] sm:$0xff] }
 0x52d   :  { %2312 = vmatprep.subr.mxu1 %v858_v4 }
 0x52e   :  { %2313 = vmatpush3.msra.mxu1 %v858_v4 }
 0x52f   :  { %2314 = vmatprep.subr.mxu1 %v857_v5 }
 0x530   :  { %2315 = vmatpush3.msra.mxu1 %v857_v5 }
 0x531   :  { %2316 = vmatprep.subr.mxu1 %v856_v6 }
 0x532   :  { %2317 = vmatpush3.msra.mxu1 %v856_v6 }
 0x533   :  { %2318 = vmatprep.subr.mxu1 %v855_v7 }
 0x534   :  { %2319 = vmatpush3.msra.mxu1 %v855_v7 }
 0x535   :  { %2320 = vmatprep.subr.mxu1 %v854_v8 }
 0x536   :  { %2321 = vmatpush3.msra.mxu1 %v854_v8 }
 0x537   :  { %2322 = vmatprep.subr.mxu1 %v853_v9 }
 0x538   :  { %2323 = vmatpush3.msra.mxu1 %v853_v9 }
 0x539   :  { %2324 = vmatprep.subr.mxu1 %v852_v10 }
 0x53a   :  { %2325 = vmatpush3.msra.mxu1 %v852_v10 }
 0x53b   :  { %2326 = vmatprep.subr.mxu1 %v851_v11 }
 0x53c   :  { %2327 = vmatpush3.msra.mxu1 %v851_v11 }
 0x53d   :  { %2328 = vmatprep.subr.mxu1 %v850_v12 }
 0x53e   :  { %2329 = vmatpush3.msra.mxu1 %v850_v12 }
 0x53f   :  { %2330 = vmatprep.subr.mxu1 %v849_v13 }
 0x540   :  { %2331 = vmatpush3.msra.mxu1 %v849_v13 }
 0x541   :  { %2332 = vmatprep.subr.mxu1 %v848_v14 }
 0x542   :  { %2333 = vmatpush3.msra.mxu1 %v848_v14 }
 0x543   :  { %2334 = vmatprep.subr.mxu1 %v847_v15 }
 0x544   :  { %2335 = vmatpush3.msra.mxu1 %v847_v15 }
 0x545   :  { %2336 = vmatprep.subr.mxu1 %v846_v16 }
 0x546   :  { %2337 = vmatpush3.msra.mxu1 %v846_v16 }
 0x547   :  { %2338 = vmatprep.subr.mxu1 %v845_v17 }
 0x548   :  { %2339 = vmatpush3.msra.mxu1 %v845_v17 }
 0x549   :  { %2340 = vmatprep.subr.mxu1 %v844_v18 }
 0x54a   :  { %2341 = vmatpush3.msra.mxu1 %v844_v18 }
 0x54b   :  { %2343 = vmatmul.mubr.f32.vlgmr.msra.gmra.mxu1 %v3115_v45  ;;  %2389 = vmatprep.subr.mxu1 %v2777_v0 }
 0x54c   :  { %2345 = vmatprep.mubr.f32.mxu1 %v3153_v50  ;;  %2390 = vmatpush3.msra.mxu1 %v3275_v19 }
 0x54d   :  { %2391 = vmatprep.subr.mxu1 %v2777_v0 }
 0x54e   :  { %2392 = vmatpush3.msra.mxu1 %v3278_v20 }
 0x54f   :  { %2346 = vmatmul.mubr.f32.gmra.mxu1 %v3192_v55  ;;  %2393 = vmatprep.subr.mxu1 %v2777_v0 }
 0x550   :  { %2348 = vmatprep.mubr.f32.mxu1 %v3230_v60  ;;  %2394 = vmatpush3.msra.mxu1 %v3282_v21 }
 0x551   :  { %2395 = vmatprep.subr.mxu1 %v2777_v0 }
 0x552   :  { %2396 = vmatpush3.msra.mxu1 %v3286_v22 }
 0x553   :  { %2349 = vmatmul.mubr.f32.gmra.mxu1 %v2687_v3  ;;  %2397 = vmatprep.subr.mxu1 %v2777_v0 }
 0x554   :  { %2398 = vmatpush3.msra.mxu1 %v3290_v23 }
 0x555   :  { %2399 = vmatprep.subr.mxu1 %v2777_v0 }
 0x556   :  { %2400 = vmatpush3.msra.mxu1 %v3294_v24 }
 0x557   :  { %2401 = vmatprep.subr.mxu1 %v2777_v0 }
 0x558   :  { %2402 = vmatpush3.msra.mxu1 %v3298_v25 }
 0x559   :  { %2403 = vmatprep.subr.mxu1 %v2777_v0 }
 0x55a   :  { %2404 = vmatpush3.msra.mxu1 %v3302_v26 }
 0x55b   :  { %2405 = vmatprep.subr.mxu1 %v2777_v0 }
 0x55c   :  { %2406 = vmatpush3.msra.mxu1 %v3306_v27 }
 0x55d   :  { %2407 = vmatprep.subr.mxu1 %v2777_v0 }
 0x55e   :  { %2408 = vmatpush3.msra.mxu1 %v3310_v29 }
 0x55f   :  { %2409 = vmatprep.subr.mxu1 %v2777_v0 }
 0x560   :  { %2410 = vmatpush3.msra.mxu1 %v3314_v30 }
 0x561   :  { %2411 = vmatprep.subr.mxu1 %v2777_v0 }
 0x562   :  { %2412 = vmatpush3.msra.mxu1 %v3318_v31 }
 0x563   :  { %2413 = vmatprep.subr.mxu1 %v2777_v0 }
 0x564   :  { %2414 = vmatpush3.msra.mxu1 %v3322_v32 }
 0x565   :  { %2415 = vmatprep.subr.mxu1 %v2777_v0 }
 0x566   :  { %2416 = vmatpush3.msra.mxu1 %v3326_v33 }
 0x567   :  { %2417 = vmatprep.subr.mxu1 %v2777_v0 }
 0x568   :  { %2418 = vmatpush3.msra.mxu1 %v3330_v34 }
 0x569   :  { %2419 = vmatprep.subr.mxu1 %v2777_v0 }
 0x56a   :  { %2420 = vmatpush3.msra.mxu1 %v3334_v35 }
 0x56b   :  { %2459 = vmatprep.subr.mxu1 %v2777_v0 }
 0x5eb   :  { %v755_v37 = vpop.f32.mrf.mxu1 }
 0x5ec   :  { %v759_v38 = vadd.f32 %v755_v37, %v228_v36  ;;  %v1586_v36 = vld [vmem:[#allocation7 + $0x30] sm:$0xff]  ;;  %v1585_v37 = vld [vmem:[#allocation7 + $0x28] sm:$0xff] }
 0x5ed   :  { %v2274_v41 = vpop.f32.mrf.mxu1 }
 0x5ee   :  { %2688 = vtanh.f32 %v759_v38  ;;  %v1584_v38 = vld [vmem:[#allocation7 + $0x20] sm:$0xff]  ;;  %v1583_v41 = vld [vmem:[#allocation7 + $0x18] sm:$0xff] }
 0x5fb   :  { %v2689_v42 = vpop.eup %2688 }
 0x5fc   :  { %2308 = vmatmul.mubr.f32.vlgmr.msra.gmra.mxu0 %v2689_v42  ;;  %2351 = vmatprep.mubr.f32.mxu1 %v2689_v42  ;;  %v1582_v42 = vld [vmem:[#allocation7 + $0x10] sm:$0xff] }
 0x5fd   :  { %2355 = vmatpush3.msra.mxu0 %v3275_v19  ;;  %2386 = vmatprep.mubr.msk.f32.mxu0 %vm2778_vm0, %v2777_v0 }
 0x5fe   :  { %2356 = vmatprep.subr.mxu0 %v2777_v0 }
 0x5ff   :  { %2357 = vmatpush3.msra.mxu0 %v3278_v20 }
 0x600   :  { %2358 = vmatprep.subr.mxu0 %v2777_v0 }
 0x601   :  { %2359 = vmatpush3.msra.mxu0 %v3282_v21 }
 0x602   :  { %2360 = vmatprep.subr.mxu0 %v2777_v0 }
 0x603   :  { %2361 = vmatpush3.msra.mxu0 %v3286_v22 }
 0x604   :  { %2362 = vmatprep.subr.mxu0 %v2777_v0 }
 0x605   :  { %2363 = vmatpush3.msra.mxu0 %v3290_v23 }
 0x606   :  { %2364 = vmatprep.subr.mxu0 %v2777_v0 }
 0x607   :  { %2365 = vmatpush3.msra.mxu0 %v3294_v24 }
 0x608   :  { %2366 = vmatprep.subr.mxu0 %v2777_v0 }
 0x609   :  { %2367 = vmatpush3.msra.mxu0 %v3298_v25 }
 0x60a   :  { %2368 = vmatprep.subr.mxu0 %v2777_v0 }
 0x60b   :  { %2369 = vmatpush3.msra.mxu0 %v3302_v26  ;;  %v2344_v47 = vpop.f32.mrf.mxu1 }
 0x60c   :  { %2370 = vmatprep.subr.mxu0 %v2777_v0  ;;  %v955_v59 = vadd.f32 %v2344_v47, %v3417_v49 }
 0x60d   :  { %2371 = vmatpush3.msra.mxu0 %v3306_v27  ;;  %v949_v48 = vpop.f32.mrf.mxu1 }
 0x60e   :  { %2372 = vmatprep.subr.mxu0 %v2777_v0  ;;  %v950_v50 = vadd.f32 %v3417_v49, %v949_v48 }
 0x60f   :  { %2373 = vmatpush3.msra.mxu0 %v3310_v29  ;;  %v3454_v53 = vpop.f32.mrf.mxu1 }
 0x610   :  { %2374 = vmatprep.subr.mxu0 %v2777_v0  ;;  %v965_v6 = vadd.f32 %v3454_v53, %v3417_v49 }
 0x611   :  { %2375 = vmatpush3.msra.mxu0 %v3314_v30  ;;  %v959_v54 = vpop.f32.mrf.mxu1 }
 0x612   :  { %2376 = vmatprep.subr.mxu0 %v2777_v0  ;;  %v960_v1 = vadd.f32 %v3417_v49, %v959_v54 }
 0x613   :  { %2377 = vmatpush3.msra.mxu0 %v3318_v31  ;;  %v3456_v55 = vpop.f32.mrf.mxu1 }
 0x614   :  { %2378 = vmatprep.subr.mxu0 %v2777_v0  ;;  %v975_v16 = vadd.f32 %v3456_v55, %v3417_v49 }
 0x615   :  { %2379 = vmatpush3.msra.mxu0 %v3322_v32  ;;  %v3458_v56 = vpop.f32.mrf.mxu1 }
 0x616   :  { %2380 = vmatprep.subr.mxu0 %v2777_v0  ;;  %v970_v11 = vadd.f32 %v3417_v49, %v3458_v56 }
 0x617   :  { %2381 = vmatpush3.msra.mxu0 %v3326_v33 }
 0x618   :  { %2382 = vmatprep.subr.mxu0 %v2777_v0 }
 0x619   :  { %2383 = vmatpush3.msra.mxu0 %v3330_v34 }
 0x61a   :  { %2384 = vmatprep.subr.mxu0 %v2777_v0 }
 0x61b   :  { %2385 = vmatpush3.msra.mxu0 %v3334_v35 }
 0x61c   :  { %2387 = vmatmul.mubr.f32.vlgmr.msra.gmra.mxu0 %v2777_v0  ;;  %2424 = vmatprep.subr.mxu0 %v2777_v0 }
 0x61d   :  { %2425 = vmatpush3.msra.mxu0 %v3275_v19  ;;  %2456 = vmatprep.mubr.msk.f32.mxu0 %vm2778_vm0, %v2777_v0 }
 0x61e   :  { %2426 = vmatprep.subr.mxu0 %v2777_v0 }
 0x61f   :  { %2427 = vmatpush3.msra.mxu0 %v3278_v20 }
 0x620   :  { %2428 = vmatprep.subr.mxu0 %v2777_v0 }
 0x621   :  { %2429 = vmatpush3.msra.mxu0 %v3282_v21 }
 0x622   :  { %2430 = vmatprep.subr.mxu0 %v2777_v0 }
 0x623   :  { %2431 = vmatpush3.msra.mxu0 %v3286_v22 }
 0x624   :  { %2432 = vmatprep.subr.mxu0 %v2777_v0 }
 0x625   :  { %2433 = vmatpush3.msra.mxu0 %v3290_v23 }
 0x626   :  { %2434 = vmatprep.subr.mxu0 %v2777_v0 }
 0x627   :  { %2435 = vmatpush3.msra.mxu0 %v3294_v24 }
 0x628   :  { %2436 = vmatprep.subr.mxu0 %v2777_v0 }
 0x629   :  { %2437 = vmatpush3.msra.mxu0 %v3298_v25 }
 0x62a   :  { %2438 = vmatprep.subr.mxu0 %v2777_v0 }
 0x62b   :  { %2439 = vmatpush3.msra.mxu0 %v3302_v26 }
 0x62c   :  { %2440 = vmatprep.subr.mxu0 %v2777_v0 }
 0x62d   :  { %2441 = vmatpush3.msra.mxu0 %v3306_v27 }
 0x62e   :  { %2442 = vmatprep.subr.mxu0 %v2777_v0 }
 0x62f   :  { %2443 = vmatpush3.msra.mxu0 %v3310_v29 }
 0x630   :  { %2444 = vmatprep.subr.mxu0 %v2777_v0 }
 0x631   :  { %2445 = vmatpush3.msra.mxu0 %v3314_v30 }
 0x632   :  { %2446 = vmatprep.subr.mxu0 %v2777_v0 }
 0x633   :  { %2447 = vmatpush3.msra.mxu0 %v3318_v31 }
 0x634   :  { %2448 = vmatprep.subr.mxu0 %v2777_v0 }
 0x635   :  { %2449 = vmatpush3.msra.mxu0 %v3322_v32 }
 0x636   :  { %2450 = vmatprep.subr.mxu0 %v2777_v0 }
 0x637   :  { %2451 = vmatpush3.msra.mxu0 %v3326_v33 }
 0x638   :  { %2452 = vmatprep.subr.mxu0 %v2777_v0 }
 0x639   :  { %2453 = vmatpush3.msra.mxu0 %v3330_v34 }
 0x63a   :  { %2454 = vmatprep.subr.mxu0 %v2777_v0 }
 0x63b   :  { %2455 = vmatpush3.msra.mxu0 %v3334_v35 }
 0x63c   :  { %2494 = vmatprep.subr.mxu0 %v2777_v0 }
 0x6bc   :  { %v829_v43 = vpop.f32.mrf.mxu0 }
 0x6bd   :  { %v833_v44 = vadd.f32 %v829_v43, %v233_v40  ;;  %v1581_v40 = vld [vmem:[#allocation7 + $0x8] sm:$0xff]  ;;  %v1580_v43 = vld [vmem:[#allocation7] sm:$0xff] }
 0x6be   :  { %v2309_v45 = vpop.f32.mrf.mxu0 }
 0x6bf   :  { %2690 = vtanh.f32 %v833_v44 }
 0x6cc   :  { %v2691_v46 = vpop.eup %2690 }
 0x6cd   :  { %2352 = vmatmul.mubr.f32.gmra.mxu1 %v2691_v46 }
 0x6ce   :  { %2421 = vmatprep.mubr.msk.f32.mxu1 %vm2778_vm0, %v2777_v0 }
 0x6dc   :  { %v1063_v51 = vpop.f32.mrf.mxu0 }
 0x6dd   :  { %v1067_v28 = vadd.f32 %v1063_v51, %v950_v50  ;;  %v1690_v50 = vld [vmem:[%s3642_s8] ss:$0 sm:$0xff] }
 0x6de   :  { %v2388_v39 = vpop.f32.mrf.mxu0 }
 0x6df   :  { %2692 = vtanh.f32 %v1067_v28 }
 0x6ec   :  { %v2693_v52 = vpop.eup %2692 }
 0x6ed   :  { %2422 = vmatmul.mubr.f32.vlgmr.msra.gmra.mxu1 %v2693_v52 }
 0x6ee   :  { %2460 = vmatpush3.msra.mxu1 %v3275_v19  ;;  %2491 = vmatprep.mubr.msk.f32.mxu1 %vm2778_vm0, %v2777_v0 }
 0x6ef   :  { %2461 = vmatprep.subr.mxu1 %v2777_v0 }
 0x6f0   :  { %2462 = vmatpush3.msra.mxu1 %v3278_v20 }
 0x6f1   :  { %2463 = vmatprep.subr.mxu1 %v2777_v0 }
 0x6f2   :  { %2464 = vmatpush3.msra.mxu1 %v3282_v21 }
 0x6f3   :  { %2465 = vmatprep.subr.mxu1 %v2777_v0 }
 0x6f4   :  { %2466 = vmatpush3.msra.mxu1 %v3286_v22 }
 0x6f5   :  { %2467 = vmatprep.subr.mxu1 %v2777_v0 }
 0x6f6   :  { %2468 = vmatpush3.msra.mxu1 %v3290_v23 }
 0x6f7   :  { %2469 = vmatprep.subr.mxu1 %v2777_v0 }
 0x6f8   :  { %2470 = vmatpush3.msra.mxu1 %v3294_v24 }
 0x6f9   :  { %2471 = vmatprep.subr.mxu1 %v2777_v0 }
 0x6fa   :  { %2472 = vmatpush3.msra.mxu1 %v3298_v25 }
 0x6fb   :  { %2473 = vmatprep.subr.mxu1 %v2777_v0 }
 0x6fc   :  { %2474 = vmatpush3.msra.mxu1 %v3302_v26 }
 0x6fd   :  { %2475 = vmatprep.subr.mxu1 %v2777_v0 }
 0x6fe   :  { %2476 = vmatpush3.msra.mxu1 %v3306_v27 }
 0x6ff   :  { %2477 = vmatprep.subr.mxu1 %v2777_v0 }
 0x700   :  { %2478 = vmatpush3.msra.mxu1 %v3310_v29 }
 0x701   :  { %2479 = vmatprep.subr.mxu1 %v2777_v0 }
 0x702   :  { %2480 = vmatpush3.msra.mxu1 %v3314_v30 }
 0x703   :  { %2481 = vmatprep.subr.mxu1 %v2777_v0 }
 0x704   :  { %2482 = vmatpush3.msra.mxu1 %v3318_v31 }
 0x705   :  { %2483 = vmatprep.subr.mxu1 %v2777_v0 }
 0x706   :  { %2484 = vmatpush3.msra.mxu1 %v3322_v32 }
 0x707   :  { %2485 = vmatprep.subr.mxu1 %v2777_v0 }
 0x708   :  { %2486 = vmatpush3.msra.mxu1 %v3326_v33 }
 0x709   :  { %2487 = vmatprep.subr.mxu1 %v2777_v0 }
 0x70a   :  { %2488 = vmatpush3.msra.mxu1 %v3330_v34 }
 0x70b   :  { %2489 = vmatprep.subr.mxu1 %v2777_v0 }
 0x70c   :  { %2490 = vmatpush3.msra.mxu1 %v3334_v35 }
 0x70d   :  { %2529 = vmatprep.subr.mxu1 %v2777_v0 }
 0x78d   :  { %v3460_v57 = vpop.f32.mrf.mxu1 }
 0x78e   :  { %v985_v44 = vadd.f32 %v3460_v57, %v3417_v49 }
 0x78f   :  { %v3462_v58 = vpop.f32.mrf.mxu1 }
 0x7ad   :  { %v1136_v60 = vpop.f32.mrf.mxu1 }
 0x7ae   :  { %v1140_v61 = vadd.f32 %v1136_v60, %v955_v59 }
 0x7af   :  { %v2423_v62 = vpop.f32.mrf.mxu1 }
 0x7b0   :  { %2694 = vtanh.f32 %v1140_v61 }
 0x7bd   :  { %v2695_v63 = vpop.eup %2694 }
 0x7be   :  { %2457 = vmatmul.mubr.f32.vlgmr.msra.gmra.mxu0 %v2695_v63 }
 0x7bf   :  { %2495 = vmatpush3.msra.mxu0 %v3275_v19  ;;  %2526 = vmatprep.mubr.msk.f32.mxu0 %vm2778_vm0, %v2777_v0 }
 0x7c0   :  { %2496 = vmatprep.subr.mxu0 %v2777_v0 }
 0x7c1   :  { %2497 = vmatpush3.msra.mxu0 %v3278_v20 }
 0x7c2   :  { %2498 = vmatprep.subr.mxu0 %v2777_v0 }
 0x7c3   :  { %2499 = vmatpush3.msra.mxu0 %v3282_v21 }
 0x7c4   :  { %2500 = vmatprep.subr.mxu0 %v2777_v0 }
 0x7c5   :  { %2501 = vmatpush3.msra.mxu0 %v3286_v22 }
 0x7c6   :  { %2502 = vmatprep.subr.mxu0 %v2777_v0 }
 0x7c7   :  { %2503 = vmatpush3.msra.mxu0 %v3290_v23 }
 0x7c8   :  { %2504 = vmatprep.subr.mxu0 %v2777_v0 }
 0x7c9   :  { %2505 = vmatpush3.msra.mxu0 %v3294_v24 }
 0x7ca   :  { %2506 = vmatprep.subr.mxu0 %v2777_v0 }
 0x7cb   :  { %2507 = vmatpush3.msra.mxu0 %v3298_v25 }
 0x7cc   :  { %2508 = vmatprep.subr.mxu0 %v2777_v0 }
 0x7cd   :  { %2509 = vmatpush3.msra.mxu0 %v3302_v26 }
 0x7ce   :  { %2510 = vmatprep.subr.mxu0 %v2777_v0 }
 0x7cf   :  { %2511 = vmatpush3.msra.mxu0 %v3306_v27 }
 0x7d0   :  { %2512 = vmatprep.subr.mxu0 %v2777_v0 }
 0x7d1   :  { %2513 = vmatpush3.msra.mxu0 %v3310_v29 }
 0x7d2   :  { %2514 = vmatprep.subr.mxu0 %v2777_v0 }
 0x7d3   :  { %2515 = vmatpush3.msra.mxu0 %v3314_v30 }
 0x7d4   :  { %2516 = vmatprep.subr.mxu0 %v2777_v0 }
 0x7d5   :  { %2517 = vmatpush3.msra.mxu0 %v3318_v31 }
 0x7d6   :  { %2518 = vmatprep.subr.mxu0 %v2777_v0 }
 0x7d7   :  { %2519 = vmatpush3.msra.mxu0 %v3322_v32 }
 0x7d8   :  { %2520 = vmatprep.subr.mxu0 %v2777_v0 }
 0x7d9   :  { %2521 = vmatpush3.msra.mxu0 %v3326_v33 }
 0x7da   :  { %2522 = vmatprep.subr.mxu0 %v2777_v0 }
 0x7db   :  { %2523 = vmatpush3.msra.mxu0 %v3330_v34 }
 0x7dc   :  { %2524 = vmatprep.subr.mxu0 %v2777_v0 }
 0x7dd   :  { %2525 = vmatpush3.msra.mxu0 %v3334_v35 }
 0x7de   :  { %2564 = vmatprep.subr.mxu0 %v2777_v0 }
 0x87e   :  { %v1209_v2 = vpop.f32.mrf.mxu0 }
 0x87f   :  { %v1213_v3 = vadd.f32 %v1209_v2, %v960_v1 }
 0x880   :  { %v2458_v4 = vpop.f32.mrf.mxu0 }
 0x881   :  { %2696 = vtanh.f32 %v1213_v3 }
 0x88e   :  { %v2697_v5 = vpop.eup %2696 }
 0x88f   :  { %2492 = vmatmul.mubr.f32.vlgmr.msra.gmra.mxu1 %v2697_v5 }
 0x890   :  { %2530 = vmatpush3.msra.mxu1 %v3275_v19  ;;  %2561 = vmatprep.mubr.msk.f32.mxu1 %vm2778_vm0, %v2777_v0 }
 0x891   :  { %2531 = vmatprep.subr.mxu1 %v2777_v0 }
 0x892   :  { %2532 = vmatpush3.msra.mxu1 %v3278_v20 }
 0x893   :  { %2533 = vmatprep.subr.mxu1 %v2777_v0 }
 0x894   :  { %2534 = vmatpush3.msra.mxu1 %v3282_v21 }
 0x895   :  { %2535 = vmatprep.subr.mxu1 %v2777_v0 }
 0x896   :  { %2536 = vmatpush3.msra.mxu1 %v3286_v22 }
 0x897   :  { %2537 = vmatprep.subr.mxu1 %v2777_v0 }
 0x898   :  { %2538 = vmatpush3.msra.mxu1 %v3290_v23 }
 0x899   :  { %2539 = vmatprep.subr.mxu1 %v2777_v0 }
 0x89a   :  { %2540 = vmatpush3.msra.mxu1 %v3294_v24 }
 0x89b   :  { %2541 = vmatprep.subr.mxu1 %v2777_v0 }
 0x89c   :  { %2542 = vmatpush3.msra.mxu1 %v3298_v25 }
 0x89d   :  { %2543 = vmatprep.subr.mxu1 %v2777_v0 }
 0x89e   :  { %2544 = vmatpush3.msra.mxu1 %v3302_v26 }
 0x89f   :  { %2545 = vmatprep.subr.mxu1 %v2777_v0 }
 0x8a0   :  { %2546 = vmatpush3.msra.mxu1 %v3306_v27 }
 0x8a1   :  { %2547 = vmatprep.subr.mxu1 %v2777_v0 }
 0x8a2   :  { %2548 = vmatpush3.msra.mxu1 %v3310_v29 }
 0x8a3   :  { %2549 = vmatprep.subr.mxu1 %v2777_v0 }
 0x8a4   :  { %2550 = vmatpush3.msra.mxu1 %v3314_v30 }
 0x8a5   :  { %2551 = vmatprep.subr.mxu1 %v2777_v0 }
 0x8a6   :  { %2552 = vmatpush3.msra.mxu1 %v3318_v31 }
 0x8a7   :  { %2553 = vmatprep.subr.mxu1 %v2777_v0 }
 0x8a8   :  { %2554 = vmatpush3.msra.mxu1 %v3322_v32 }
 0x8a9   :  { %2555 = vmatprep.subr.mxu1 %v2777_v0 }
 0x8aa   :  { %2556 = vmatpush3.msra.mxu1 %v3326_v33 }
 0x8ab   :  { %2557 = vmatprep.subr.mxu1 %v2777_v0 }
 0x8ac   :  { %2558 = vmatpush3.msra.mxu1 %v3330_v34 }
 0x8ad   :  { %2559 = vmatprep.subr.mxu1 %v2777_v0 }
 0x8ae   :  { %2560 = vmatpush3.msra.mxu1 %v3334_v35 }
 0x8af   :  { %2599 = vmatprep.subr.mxu1 %v2777_v0 }
 0x94f   :  { %v1282_v7 = vpop.f32.mrf.mxu1 }
 0x950   :  { %v1286_v8 = vadd.f32 %v1282_v7, %v965_v6 }
 0x951   :  { %v2493_v9 = vpop.f32.mrf.mxu1 }
 0x952   :  { %2698 = vtanh.f32 %v1286_v8 }
 0x95f   :  { %v2699_v10 = vpop.eup %2698 }
 0x960   :  { %2527 = vmatmul.mubr.f32.vlgmr.msra.gmra.mxu0 %v2699_v10 }
 0x961   :  { %2565 = vmatpush3.msra.mxu0 %v3275_v19  ;;  %2596 = vmatprep.mubr.msk.f32.mxu0 %vm2778_vm0, %v2777_v0 }
 0x962   :  { %2566 = vmatprep.subr.mxu0 %v2777_v0 }
 0x963   :  { %2567 = vmatpush3.msra.mxu0 %v3278_v20 }
 0x964   :  { %2568 = vmatprep.subr.mxu0 %v2777_v0 }
 0x965   :  { %2569 = vmatpush3.msra.mxu0 %v3282_v21 }
 0x966   :  { %2570 = vmatprep.subr.mxu0 %v2777_v0 }
 0x967   :  { %2571 = vmatpush3.msra.mxu0 %v3286_v22 }
 0x968   :  { %2572 = vmatprep.subr.mxu0 %v2777_v0 }
 0x969   :  { %2573 = vmatpush3.msra.mxu0 %v3290_v23 }
 0x96a   :  { %2574 = vmatprep.subr.mxu0 %v2777_v0 }
 0x96b   :  { %2575 = vmatpush3.msra.mxu0 %v3294_v24 }
 0x96c   :  { %2576 = vmatprep.subr.mxu0 %v2777_v0 }
 0x96d   :  { %2577 = vmatpush3.msra.mxu0 %v3298_v25 }
 0x96e   :  { %2578 = vmatprep.subr.mxu0 %v2777_v0 }
 0x96f   :  { %2579 = vmatpush3.msra.mxu0 %v3302_v26 }
 0x970   :  { %2580 = vmatprep.subr.mxu0 %v2777_v0 }
 0x971   :  { %2581 = vmatpush3.msra.mxu0 %v3306_v27 }
 0x972   :  { %2582 = vmatprep.subr.mxu0 %v2777_v0 }
 0x973   :  { %2583 = vmatpush3.msra.mxu0 %v3310_v29 }
 0x974   :  { %2584 = vmatprep.subr.mxu0 %v2777_v0 }
 0x975   :  { %2585 = vmatpush3.msra.mxu0 %v3314_v30 }
 0x976   :  { %2586 = vmatprep.subr.mxu0 %v2777_v0 }
 0x977   :  { %2587 = vmatpush3.msra.mxu0 %v3318_v31 }
 0x978   :  { %2588 = vmatprep.subr.mxu0 %v2777_v0 }
 0x979   :  { %2589 = vmatpush3.msra.mxu0 %v3322_v32 }
 0x97a   :  { %2590 = vmatprep.subr.mxu0 %v2777_v0 }
 0x97b   :  { %2591 = vmatpush3.msra.mxu0 %v3326_v33 }
 0x97c   :  { %2592 = vmatprep.subr.mxu0 %v2777_v0 }
 0x97d   :  { %2593 = vmatpush3.msra.mxu0 %v3330_v34 }
 0x97e   :  { %2594 = vmatprep.subr.mxu0 %v2777_v0 }
 0x97f   :  { %2595 = vmatpush3.msra.mxu0 %v3334_v35 }
 0x980   :  { %2634 = vmatprep.subr.mxu0 %v2777_v0 }
 0xa20   :  { %v1355_v12 = vpop.f32.mrf.mxu0 }
 0xa21   :  { %v1359_v13 = vadd.f32 %v1355_v12, %v970_v11 }
 0xa22   :  { %v2528_v14 = vpop.f32.mrf.mxu0 }
 0xa23   :  { %2700 = vtanh.f32 %v1359_v13 }
 0xa30   :  { %v2701_v15 = vpop.eup %2700 }
 0xa31   :  { %2562 = vmatmul.mubr.f32.vlgmr.msra.gmra.mxu1 %v2701_v15 }
 0xa32   :  { %2600 = vmatpush3.msra.mxu1 %v3275_v19  ;;  %2631 = vmatprep.mubr.msk.f32.mxu1 %vm2778_vm0, %v2777_v0 }
 0xa33   :  { %2601 = vmatprep.subr.mxu1 %v2777_v0 }
 0xa34   :  { %2602 = vmatpush3.msra.mxu1 %v3278_v20 }
 0xa35   :  { %2603 = vmatprep.subr.mxu1 %v2777_v0 }
 0xa36   :  { %2604 = vmatpush3.msra.mxu1 %v3282_v21  ;;  %v1595_v21 = vld [vmem:[#allocation7 + $0x78] sm:$0xff] }
 0xa37   :  { %2605 = vmatprep.subr.mxu1 %v2777_v0 }
 0xa38   :  { %2606 = vmatpush3.msra.mxu1 %v3286_v22  ;;  %v1594_v22 = vld [vmem:[#allocation7 + $0x70] sm:$0xff] }
 0xa39   :  { %2607 = vmatprep.subr.mxu1 %v2777_v0 }
 0xa3a   :  { %2608 = vmatpush3.msra.mxu1 %v3290_v23  ;;  %v1593_v23 = vld [vmem:[#allocation7 + $0x68] sm:$0xff] }
 0xa3b   :  { %2609 = vmatprep.subr.mxu1 %v2777_v0 }
 0xa3c   :  { %2610 = vmatpush3.msra.mxu1 %v3294_v24  ;;  %v1592_v24 = vld [vmem:[#allocation7 + $0x60] sm:$0xff] }
 0xa3d   :  { %2611 = vmatprep.subr.mxu1 %v2777_v0 }
 0xa3e   :  { %2612 = vmatpush3.msra.mxu1 %v3298_v25  ;;  %v1591_v25 = vld [vmem:[#allocation7 + $0x58] sm:$0xff] }
 0xa3f   :  { %2613 = vmatprep.subr.mxu1 %v2777_v0 }
 0xa40   :  { %2614 = vmatpush3.msra.mxu1 %v3302_v26  ;;  %v1590_v26 = vld [vmem:[#allocation7 + $0x50] sm:$0xff] }
 0xa41   :  { %2615 = vmatprep.subr.mxu1 %v2777_v0 }
 0xa42   :  { %2616 = vmatpush3.msra.mxu1 %v3306_v27  ;;  %v1589_v27 = vld [vmem:[#allocation7 + $0x48] sm:$0xff] }
 0xa43   :  { %2617 = vmatprep.subr.mxu1 %v2777_v0 }
 0xa44   :  { %2618 = vmatpush3.msra.mxu1 %v3310_v29  ;;  %v980_v29 = vadd.f32 %v3417_v49, %v3462_v58 }
 0xa45   :  { %2619 = vmatprep.subr.mxu1 %v2777_v0 }
 0xa46   :  { %2620 = vmatpush3.msra.mxu1 %v3314_v30 }
 0xa47   :  { %2621 = vmatprep.subr.mxu1 %v2777_v0 }
 0xa48   :  { %2622 = vmatpush3.msra.mxu1 %v3318_v31 }
 0xa49   :  { %2623 = vmatprep.subr.mxu1 %v2777_v0 }
 0xa4a   :  { %2624 = vmatpush3.msra.mxu1 %v3322_v32 }
 0xa4b   :  { %2625 = vmatprep.subr.mxu1 %v2777_v0 }
 0xa4c   :  { %2626 = vmatpush3.msra.mxu1 %v3326_v33 }
 0xa4d   :  { %2627 = vmatprep.subr.mxu1 %v2777_v0 }
 0xa4e   :  { %2628 = vmatpush3.msra.mxu1 %v3330_v34  ;;  %v1588_v34 = vld [vmem:[#allocation7 + $0x40] sm:$0xff] }
 0xa4f   :  { %2629 = vmatprep.subr.mxu1 %v2777_v0 }
 0xa50   :  { %2630 = vmatpush3.msra.mxu1 %v3334_v35  ;;  %v1587_v35 = vld [vmem:[#allocation7 + $0x38] sm:$0xff] }
 0xaf1   :  { %v1428_v17 = vpop.f32.mrf.mxu1 }
 0xaf2   :  { %v1432_v18 = vadd.f32 %v1428_v17, %v975_v16 }
 0xaf3   :  { %v2563_v19 = vpop.f32.mrf.mxu1 }
 0xaf4   :  { %2702 = vtanh.f32 %v1432_v18 }
 0xb01   :  { %v2703_v20 = vpop.eup %2702 }
 0xb02   :  { %2597 = vmatmul.mubr.f32.vlgmr.msra.gmra.mxu0 %v2703_v20 }
 0xb03   :  { %2666 = vmatprep.mubr.msk.f32.mxu0 %vm2778_vm0, %v2777_v0  ;;  %2635 = vmatpush3.msra.mxu0 %v1595_v21 }
 0xb04   :  { %2636 = vmatprep.subr.mxu0 %v2777_v0 }
 0xb05   :  { %2637 = vmatpush3.msra.mxu0 %v1594_v22 }
 0xb06   :  { %2638 = vmatprep.subr.mxu0 %v2777_v0 }
 0xb07   :  { %2639 = vmatpush3.msra.mxu0 %v1593_v23 }
 0xb08   :  { %2640 = vmatprep.subr.mxu0 %v2777_v0 }
 0xb09   :  { %2641 = vmatpush3.msra.mxu0 %v1592_v24 }
 0xb0a   :  { %2642 = vmatprep.subr.mxu0 %v2777_v0 }
 0xb0b   :  { %2643 = vmatpush3.msra.mxu0 %v1591_v25 }
 0xb0c   :  { %2644 = vmatprep.subr.mxu0 %v2777_v0 }
 0xb0d   :  { %2645 = vmatpush3.msra.mxu0 %v1590_v26 }
 0xb0e   :  { %2646 = vmatprep.subr.mxu0 %v2777_v0 }
 0xb0f   :  { %2647 = vmatpush3.msra.mxu0 %v1589_v27 }
 0xb10   :  { %2648 = vmatprep.subr.mxu0 %v2777_v0 }
 0xb11   :  { %2649 = vmatpush3.msra.mxu0 %v1588_v34 }
 0xb12   :  { %2650 = vmatprep.subr.mxu0 %v2777_v0 }
 0xb13   :  { %2651 = vmatpush3.msra.mxu0 %v1587_v35 }
 0xb14   :  { %2652 = vmatprep.subr.mxu0 %v2777_v0 }
 0xb15   :  { %2653 = vmatpush3.msra.mxu0 %v1586_v36 }
 0xb16   :  { %2654 = vmatprep.subr.mxu0 %v2777_v0 }
 0xb17   :  { %2655 = vmatpush3.msra.mxu0 %v1585_v37 }
 0xb18   :  { %2656 = vmatprep.subr.mxu0 %v2777_v0 }
 0xb19   :  { %2657 = vmatpush3.msra.mxu0 %v1584_v38 }
 0xb1a   :  { %2658 = vmatprep.subr.mxu0 %v2777_v0 }
 0xb1b   :  { %2659 = vmatpush3.msra.mxu0 %v1583_v41 }
 0xb1c   :  { %2660 = vmatprep.subr.mxu0 %v2777_v0 }
 0xb1d   :  { %2661 = vmatpush3.msra.mxu0 %v1582_v42 }
 0xb1e   :  { %2662 = vmatprep.subr.mxu0 %v2777_v0 }
 0xb1f   :  { %2663 = vmatpush3.msra.mxu0 %v1581_v40 }
 0xb20   :  { %2664 = vmatprep.subr.mxu0 %v2777_v0 }
 0xb21   :  { %2665 = vmatpush3.msra.mxu0 %v1580_v43 }
 0xbc2   :  { %v1501_v30 = vpop.f32.mrf.mxu0 }
 0xbc3   :  { %v1505_v31 = vadd.f32 %v1501_v30, %v980_v29 }
 0xbc4   :  { %v2598_v32 = vpop.f32.mrf.mxu0 }
 0xbc5   :  { %2704 = vtanh.f32 %v1505_v31 }
 0xbd2   :  { %v2705_v33 = vpop.eup %2704 }
 0xbd3   :  { %2632 = vmatmul.mubr.f32.vlgmr.msra.gmra.mxu1 %v2705_v33 }
 0xc93   :  { %v1574_v45 = vpop.f32.mrf.mxu1 }
 0xc94   :  { %v1578_v46 = vadd.f32 %v1574_v45, %v985_v44 }
 0xc95   :  { %v2633_v47 = vpop.f32.mrf.mxu1 }
 0xc96   :  { %2706 = vtanh.f32 %v1578_v46 }
 0xca3   :  { %v2707_v48 = vpop.eup %2706 }
 0xca4   :  { %2667 = vmatmul.mubr.f32.vlgmr.msra.gmra.mxu0 %v2707_v48 }
 0xd64   :  { %v1669_v51 = vpop.f32.mrf.mxu0 }
 0xd65   :  { %v1670_v28 = vadd.f32 %v1690_v50, %v1669_v51 }
 0xd66   :  { %v2668_v39 = vpop.f32.mrf.mxu0 }
 0xd67   :  { %1673 = vst [vmem:[%s3643_s9] sm:$0xff] %v1670_v28 }
 0xd68   :  { %1678 = vsyncpa [#allocation4], 1 }
 0xd69   :  { %1679 = vsyncpa [#allocation6], 1 }

</bundles_post_ra>
